<compile_context>
chip_gen: v5e
topology: v5e:2x2
jax: 0.10.0
libtpu: 0.0.40
codegen_flags: <defaults>
</compile_context>

<pallas_src>
import jax
import jax.numpy as jnp
from jax.experimental import pallas as pl
from jax.experimental.pallas import tpu as pltpu


def _make_fused_kernel(num_layers):
    """Kernel for a fixed stack of layers; per layer refs are (w2d, bias, mix)."""

    def kernel(*refs):
        # refs = [x_ref, (w0, b0, m0), (w1, b1, m1), ..., o_ref]
        x_ref = refs[0]
        o_ref = refs[-1]
        p = refs[1:-1]

        act = x_ref[...].astype(jnp.float32)                  # [Bt, Din0]
        for li in range(num_layers):
            w_ref, b_ref, m_ref = p[3 * li: 3 * li + 3]

            # Lane-dense MXU matmul: [Bt,Din] x [Din,H*Dout] (freq pre-folded).
            z = jnp.dot(act.astype(jnp.bfloat16), w_ref[...],
                        preferred_element_type=jnp.float32)   # [Bt, H*Dout]
            z = z + b_ref[...]                                 # flat bias (f32)
            s = jnp.sin(z)                                     # f32, EUP

            # Head mix as a second (tiny) MXU matmul with kron(attn, I).
            act = jnp.dot(s.astype(jnp.bfloat16), m_ref[...],
                          preferred_element_type=jnp.float32)  # [Bt, Dout]

        o_ref[...] = act.astype(o_ref.dtype)

    return kernel


def resonance_network_forward_pallas(x, packed_params, batch_tile=None):
    """Fused forward pass: one pallas_call for the whole layer stack."""
    B, din0 = x.shape
    dout_last = packed_params[-1][2].shape[1]

    # Keep tiny batches as one tile; tile big batches at 128 rows so the
    # "parallel" grid axis can shard across v7x's two TensorCores.
    bt = (B if B <= 128 else 128) if batch_tile is None else batch_tile
    assert B % bt == 0, "batch must divide the batch tile"

    in_specs = [pl.BlockSpec((bt, din0), lambda i: (i, 0))]
    flat_args = [x]
    for (w2d, bflat, mix) in packed_params:
        in_specs += [
            pl.BlockSpec(w2d.shape, lambda i: (0, 0)),    # [Din, H*Dout] bf16
            pl.BlockSpec(bflat.shape, lambda i: (0, 0)),  # [1,  H*Dout] f32
            pl.BlockSpec(mix.shape, lambda i: (0, 0)),    # [H*Dout, Dout] bf16
        ]
        flat_args += [w2d, bflat, mix]

    kernel = _make_fused_kernel(len(packed_params))
    return pl.pallas_call(
        kernel,
        out_shape=jax.ShapeDtypeStruct((B, dout_last), jnp.float32),
        grid=(B // bt,),
        in_specs=in_specs,
        out_specs=pl.BlockSpec((bt, dout_last), lambda i: (i, 0)),
        compiler_params=pltpu.CompilerParams(
            dimension_semantics=("parallel",)),
    )(*flat_args)


def make_forward():
    @jax.jit
    def fwd(x, packed_params):
        return resonance_network_forward_pallas(x, packed_params)
    return fwd


def init_resonance_network(key, layer_configs, heads_per_layer,
                           min_freq=4, max_freq=64):
    """Init matching the module's __init__ shapes, pre-folded for the kernel:
       w2d  = concat_h(freq[h] * W_h)            -> [Din, H*Dout] (bf16)
       bias = concat_h(freq[h] * b_h)            -> [1,  H*Dout]  (f32)
       mix  = kron(softmax(logits), I[Dout])     -> [H*Dout, Dout] (bf16)."""
    packed = []
    for (din, dout), H in zip(layer_configs, heads_per_layer):
        key, kw, kb, kl = jax.random.split(key, 4)
        bound = 1.0 / jnp.sqrt(jnp.float32(din))
        w = jax.random.uniform(kw, (H, din, dout), jnp.float32, -bound, bound)
        b = jax.random.uniform(kb, (H, dout), jnp.float32, -bound, bound)
        freqs = jnp.linspace(float(min_freq), float(max_freq), H,
                             dtype=jnp.float32)
        logits = jax.random.normal(kl, (H,), jnp.float32) * 0.02
        attn = jax.nn.softmax(logits)

        # attn[h]*sin(f[h]*(x@W_h + b_h)) == attn[h]*sin(x@(f[h]*W_h) + f[h]*b_h)
        w_scaled = w * freqs[:, None, None]
        b_scaled = b * freqs[:, None]
        w2d = jnp.transpose(w_scaled, (1, 0, 2)).reshape(din, H * dout)
        bflat = b_scaled.reshape(1, H * dout)
        mix = jnp.kron(attn.reshape(H, 1), jnp.eye(dout, dtype=jnp.float32))

        packed.append((w2d.astype(jnp.bfloat16),
                       bflat,
                       mix.astype(jnp.bfloat16)))
    return packed


def reference_forward(x, packed_params):
    """Pure-JAX reference mirroring the kernel math (incl. bf16 operand casts)."""
    act = x.astype(jnp.float32)
    for (w2d, bflat, mix) in packed_params:
        z = jnp.dot(act.astype(jnp.bfloat16).astype(jnp.float32),
                    w2d.astype(jnp.float32),
                    precision=jax.lax.Precision.HIGHEST) + bflat
        s = jnp.sin(z)
        act = jnp.dot(s.astype(jnp.bfloat16).astype(jnp.float32),
                      mix.astype(jnp.float32),
                      precision=jax.lax.Precision.HIGHEST)
    return act


if __name__ == "__main__":
    key = jax.random.PRNGKey(0)
    k_params, k_x = jax.random.split(key)

    # Small shapes consistent with the module: two layers, 8 heads each.
    layer_configs = [(32, 64), (64, 32)]
    heads_per_layer = [8, 8]
    B = 8

    params = init_resonance_network(k_params, layer_configs, heads_per_layer,
                                    min_freq=4, max_freq=64)
    x = jax.random.normal(k_x, (B, layer_configs[0][0]), jnp.float32)

    fwd = make_forward()
    y = fwd(x, params)
    jax.block_until_ready(y)

    assert y.shape == (B, layer_configs[-1][1])
    assert y.dtype == jnp.float32
    assert bool(jnp.all(jnp.isfinite(y)))

    y_ref = reference_forward(x, params)
    assert bool(jnp.allclose(y, y_ref, rtol=1e-2, atol=1e-2)), (
        float(jnp.max(jnp.abs(y - y_ref))))

    print("KERNEL_OK")
</pallas_src>

<mosaic_0001>
module attributes {stable_mosaic.version = 11 : i64} {
  func.func @kernel(%arg0: i32, %arg1: memref<8x32xf32, #tpu.memory_space<vmem>>, %arg2: memref<32x512xbf16, #tpu.memory_space<vmem>>, %arg3: memref<1x512xf32, #tpu.memory_space<vmem>>, %arg4: memref<512x64xbf16, #tpu.memory_space<vmem>>, %arg5: memref<64x256xbf16, #tpu.memory_space<vmem>>, %arg6: memref<1x256xf32, #tpu.memory_space<vmem>>, %arg7: memref<256x32xbf16, #tpu.memory_space<vmem>>, %arg8: memref<8x32xf32, #tpu.memory_space<vmem>>) attributes {dimension_semantics = [#tpu.dimension_semantics<parallel>], iteration_bounds = array<i64: 1>, scalar_prefetch = 0 : i64, scratch_operands = 0 : i64, tpu.core_type = #tpu.core_type<tc>, window_params = [{transform_indices = @transform_0, window_bounds = array<i64: 8, 32>}, {pipeline_mode = #tpu.pipeline_mode<synchronous>, transform_indices = @transform_1, window_bounds = array<i64: 32, 512>}, {pipeline_mode = #tpu.pipeline_mode<synchronous>, transform_indices = @transform_2, window_bounds = array<i64: 1, 512>}, {pipeline_mode = #tpu.pipeline_mode<synchronous>, transform_indices = @transform_3, window_bounds = array<i64: 512, 64>}, {pipeline_mode = #tpu.pipeline_mode<synchronous>, transform_indices = @transform_4, window_bounds = array<i64: 64, 256>}, {pipeline_mode = #tpu.pipeline_mode<synchronous>, transform_indices = @transform_5, window_bounds = array<i64: 1, 256>}, {pipeline_mode = #tpu.pipeline_mode<synchronous>, transform_indices = @transform_6, window_bounds = array<i64: 256, 32>}, {transform_indices = @transform_7, window_bounds = array<i64: 8, 32>}]} {
    %c0 = arith.constant 0 : index
    %c0_0 = arith.constant 0 : index
    %0 = vector.load %arg1[%c0, %c0_0] : memref<8x32xf32, #tpu.memory_space<vmem>>, vector<8x32xf32>
    %1 = arith.truncf %0 : vector<8x32xf32> to vector<8x32xbf16>
    %c0_1 = arith.constant 0 : index
    %c0_2 = arith.constant 0 : index
    %2 = vector.load %arg2[%c0_1, %c0_2] : memref<32x512xbf16, #tpu.memory_space<vmem>>, vector<32x512xbf16>
    %cst = arith.constant dense<0.000000e+00> : vector<8x512xf32>
    %3 = tpu.matmul %1, %2, %cst {dimension_numbers = #tpu.dot_dimension_numbers<[1], [0], [0], [1], [0, 0, 1, 1], [], []>} : vector<8x32xbf16>, vector<32x512xbf16>, vector<8x512xf32> -> vector<8x512xf32>
    %c0_3 = arith.constant 0 : index
    %c0_4 = arith.constant 0 : index
    %4 = vector.load %arg3[%c0_3, %c0_4] : memref<1x512xf32, #tpu.memory_space<vmem>>, vector<1x512xf32>
    %5 = vector.broadcast %4 : vector<1x512xf32> to vector<8x512xf32>
    %6 = arith.addf %3, %5 : vector<8x512xf32>
    %7 = math.sin %6 : vector<8x512xf32>
    %8 = arith.truncf %7 : vector<8x512xf32> to vector<8x512xbf16>
    %c0_5 = arith.constant 0 : index
    %c0_6 = arith.constant 0 : index
    %9 = vector.load %arg4[%c0_5, %c0_6] : memref<512x64xbf16, #tpu.memory_space<vmem>>, vector<512x64xbf16>
    %cst_7 = arith.constant dense<0.000000e+00> : vector<8x64xf32>
    %10 = tpu.matmul %8, %9, %cst_7 {dimension_numbers = #tpu.dot_dimension_numbers<[1], [0], [0], [1], [0, 0, 1, 1], [], []>} : vector<8x512xbf16>, vector<512x64xbf16>, vector<8x64xf32> -> vector<8x64xf32>
    %11 = arith.truncf %10 : vector<8x64xf32> to vector<8x64xbf16>
    %c0_8 = arith.constant 0 : index
    %c0_9 = arith.constant 0 : index
    %12 = vector.load %arg5[%c0_8, %c0_9] : memref<64x256xbf16, #tpu.memory_space<vmem>>, vector<64x256xbf16>
    %cst_10 = arith.constant dense<0.000000e+00> : vector<8x256xf32>
    %13 = tpu.matmul %11, %12, %cst_10 {dimension_numbers = #tpu.dot_dimension_numbers<[1], [0], [0], [1], [0, 0, 1, 1], [], []>} : vector<8x64xbf16>, vector<64x256xbf16>, vector<8x256xf32> -> vector<8x256xf32>
    %c0_11 = arith.constant 0 : index
    %c0_12 = arith.constant 0 : index
    %14 = vector.load %arg6[%c0_11, %c0_12] : memref<1x256xf32, #tpu.memory_space<vmem>>, vector<1x256xf32>
    %15 = vector.broadcast %14 : vector<1x256xf32> to vector<8x256xf32>
    %16 = arith.addf %13, %15 : vector<8x256xf32>
    %17 = math.sin %16 : vector<8x256xf32>
    %18 = arith.truncf %17 : vector<8x256xf32> to vector<8x256xbf16>
    %c0_13 = arith.constant 0 : index
    %c0_14 = arith.constant 0 : index
    %19 = vector.load %arg7[%c0_13, %c0_14] : memref<256x32xbf16, #tpu.memory_space<vmem>>, vector<256x32xbf16>
    %cst_15 = arith.constant dense<0.000000e+00> : vector<8x32xf32>
    %20 = tpu.matmul %18, %19, %cst_15 {dimension_numbers = #tpu.dot_dimension_numbers<[1], [0], [0], [1], [0, 0, 1, 1], [], []>} : vector<8x256xbf16>, vector<256x32xbf16>, vector<8x32xf32> -> vector<8x32xf32>
    %c0_16 = arith.constant 0 : index
    %c0_17 = arith.constant 0 : index
    %21 = vector.load %arg8[%c0_16, %c0_17] : memref<8x32xf32, #tpu.memory_space<vmem>>, vector<8x32xf32>
    tpu.vector_store %arg8[%c0_16, %c0_17], %20 {strides = array<i32>} : memref<8x32xf32, #tpu.memory_space<vmem>>, vector<8x32xf32>,
    return
  }
  func.func @transform_0(%arg0: i32) -> (i32, i32) {
    %c0_i32 = arith.constant 0 : i32
    %c0_i32_0 = arith.constant 0 : i32
    return %arg0, %c0_i32 : i32, i32
  }
  func.func @transform_1(%arg0: i32) -> (i32, i32) {
    %c0_i32 = arith.constant 0 : i32
    %c0_i32_0 = arith.constant 0 : i32
    %c0_i32_1 = arith.constant 0 : i32
    return %c0_i32, %c0_i32_0 : i32, i32
  }
  func.func @transform_2(%arg0: i32) -> (i32, i32) {
    %c0_i32 = arith.constant 0 : i32
    %c0_i32_0 = arith.constant 0 : i32
    %c0_i32_1 = arith.constant 0 : i32
    return %c0_i32, %c0_i32_0 : i32, i32
  }
  func.func @transform_3(%arg0: i32) -> (i32, i32) {
    %c0_i32 = arith.constant 0 : i32
    %c0_i32_0 = arith.constant 0 : i32
    %c0_i32_1 = arith.constant 0 : i32
    return %c0_i32, %c0_i32_0 : i32, i32
  }
  func.func @transform_4(%arg0: i32) -> (i32, i32) {
    %c0_i32 = arith.constant 0 : i32
    %c0_i32_0 = arith.constant 0 : i32
    %c0_i32_1 = arith.constant 0 : i32
    return %c0_i32, %c0_i32_0 : i32, i32
  }
  func.func @transform_5(%arg0: i32) -> (i32, i32) {
    %c0_i32 = arith.constant 0 : i32
    %c0_i32_0 = arith.constant 0 : i32
    %c0_i32_1 = arith.constant 0 : i32
    return %c0_i32, %c0_i32_0 : i32, i32
  }
  func.func @transform_6(%arg0: i32) -> (i32, i32) {
    %c0_i32 = arith.constant 0 : i32
    %c0_i32_0 = arith.constant 0 : i32
    %c0_i32_1 = arith.constant 0 : i32
    return %c0_i32, %c0_i32_0 : i32, i32
  }
  func.func @transform_7(%arg0: i32) -> (i32, i32) {
    %c0_i32 = arith.constant 0 : i32
    %c0_i32_0 = arith.constant 0 : i32
    return %arg0, %c0_i32 : i32, i32
  }
}

</mosaic_0001>

<bundles_post_ra>
// kernel: fwd.1
= control target key start
LH: loop header
LB: loop body
LE: loop exit
PB: predicated region body
PF: predicated region fallthrough
CT: control target
= control target key end

     0   :  { %s3134_s0 = inlined_call_operand.vmem [shape: f32[8,32], index: 0, kind: input, shape index: {}]   ;;  %s3135_s1 = inlined_call_operand.vmem [shape: bf16[32,512], index: 1, kind: input, shape index: {}]   ;;  %s3136_s2 = inlined_call_operand.vmem [shape: f32[1,512], index: 2, kind: input, shape index: {}]   ;;  %s3137_s3 = inlined_call_operand.vmem [shape: bf16[512,64], index: 3, kind: input, shape index: {}]   ;;  %s3138_s4 = inlined_call_operand.vmem [shape: bf16[64,256], index: 4, kind: input, shape index: {}]   ;;  %s3139_s5 = inlined_call_operand.vmem [shape: f32[1,256], index: 5, kind: input, shape index: {}]   ;;  %s3140_s6 = inlined_call_operand.vmem [shape: bf16[256,32], index: 6, kind: input, shape index: {}]   ;;  %s3141_s7 = inlined_call_operand.hbm [shape: f32[8,32], index: 7, kind: output, shape index: {}]  }
   0x1   :  { %v1662_v0 = vld [vmem:[%s3135_s1 + $0x20] sm:$0xf]  ;;  %v1930_v1 = vld [vmem:[%s3135_s1 + $0x2c] sm:$0xf0]  ;;  %v1928_v2 = vld [vmem:[%s3135_s1 + $0x24] sm:$0xf] }
   0x2   :  { %v1663_v3 = vor.u32 %v1930_v1, %v1662_v0  ;;  %v1664_v4 = vld [vmem:[%s3135_s1 + $0x30] sm:$0xf0]  ;;  %v1670_v5 = vld [vmem:[%s3135_s1 + $0x28] sm:$0xf]  ;;  %v1931_v6 = vld [vmem:[%s3135_s1 + $0x34] sm:$0xf0] }
   0x3   :  { %v1667_v7 = vor.u32 %v1928_v2, %v1664_v4  ;;  %v1671_v8 = vor.u32 %v1931_v6, %v1670_v5  ;;  %v1929_v9 = vld [vmem:[%s3135_s1 + $0x2c] sm:$0xf]  ;;  %v1672_v10 = vld [vmem:[%s3135_s1 + $0x38] sm:$0xf0]  ;;  %v1646_v11 = vld [vmem:[%s3135_s1] sm:$0xf] }
   0x4   :  { %98 = vmatpush.bf16.msra.mxu0 %v1663_v3  ;;  %v1675_v12 = vor.u32 %v1929_v9, %v1672_v10  ;;  %v1926_v13 = vld [vmem:[%s3135_s1 + $0xc] sm:$0xf0]  ;;  %v1924_v14 = vld [vmem:[%s3135_s1 + $0x4] sm:$0xf]  ;;  %v1648_v15 = vld [vmem:[%s3135_s1 + $0x10] sm:$0xf0] }
   0x5   :  { %111 = vmatpush.bf16.msra.mxu1 %v1667_v7  ;;  %124 = vmatpush.bf16.msra.mxu2 %v1671_v8  ;;  %v1647_v16 = vor.u32 %v1926_v13, %v1646_v11  ;;  %v1651_v17 = vor.u32 %v1924_v14, %v1648_v15  ;;  %v1654_v18 = vld [vmem:[%s3135_s1 + $0x8] sm:$0xf]  ;;  %v1927_v19 = vld [vmem:[%s3135_s1 + $0x14] sm:$0xf0]  ;;  %v1925_v20 = vld [vmem:[%s3135_s1 + $0xc] sm:$0xf] }
   0x6   :  { %137 = vmatpush.bf16.msra.mxu3 %v1675_v12  ;;  %v1655_v21 = vor.u32 %v1927_v19, %v1654_v18  ;;  %v1656_v22 = vld [vmem:[%s3135_s1 + $0x18] sm:$0xf0]  ;;  %v28_v23 = vld [vmem:[%s3134_s0] sm:$0xff] }
   0x7   :  { %v1659_v24 = vor.u32 %v1925_v20, %v1656_v22  ;;  %v29_v25 = vpack.c.bf16 %v28_v23, %v28_v23 }
   0x8   :  { %12 = vsyncpa [#allocation3], 0  ;;  %99 = vmatpush.bf16.msra.mxu0 %v1647_v16  ;;  %vm88_vm0 = vcmask 261120   ;;  %v2128_v26 = vld [vmem:[%s3136_s2] sm:$0xf]  ;;  %s1635_s10 = sshll.u32 %s3141_s7, 4  ;;  %s1636_s10 = int_to_ptr.hbm [resolvable:$true] %s1635_s10 }
   0x9   :  { %112 = vmatpush.bf16.msra.mxu1 %v1651_v17  ;;  %125 = vmatpush.bf16.msra.mxu2 %v1655_v21  ;;  %v40_v27 = vperm.slane %v2128_v26, 0  ;;  %v41_v28 = vperm.slane %v2128_v26, 1  ;;  %v3154_v52 = vmov 2475754826   ;;  %v3149_v54 = vmov 2131351028  }
   0xa   :  { %138 = vmatpush.bf16.msra.mxu3 %v1659_v24  ;;  %v3147_v57 = vmov 2102212464   ;;  %v3151_v59 = vmov 920167782   ;;  %v42_v2 = vperm.slane %v2128_v26, 2  ;;  %v43_v17 = vperm.slane %v2128_v26, 3 }
   0xb   :  { %1676 = vmatmul.msk.bf16.vlgmr.msra.gmra.mxu0 %vm88_vm0, %v29_v25  ;;  %v3144_v5 = vmov 1326507024   ;;  %v2027_v18 = vmov 683565275  }
   0xc   :  { %1677 = vmatmul.msk.bf16.vlgmr.msra.gmra.mxu1 %vm88_vm0, %v29_v25  ;;  %1678 = vmatmul.msk.bf16.vlgmr.msra.gmra.mxu2 %vm88_vm0, %v29_v25 }
   0xd   :  { %1679 = vmatmul.msk.bf16.vlgmr.msra.gmra.mxu3 %vm88_vm0, %v29_v25 }
  0x88   :  { %v101_v29 = vpop.f32.mrf.mxu0 }
  0x89   :  { %v2132_v30 = vadd.f32 %v101_v29, %v40_v27  ;;  %v114_v31 = vpop.f32.mrf.mxu1 }
  0x8a   :  { %v2134_v32 = vadd.f32 %v114_v31, %v41_v28 }
  0x8b   :  { %v147_v33 = vand.u32 2139095040, %v2132_v30  ;;  %v3153_v44 = vand.u32 2147483647, %v2132_v30 }
  0x8c   :  { %v302_v34 = vand.u32 2139095040, %v2134_v32  ;;  %v3146_v48 = vand.u32 2147483647, %v2134_v32 }
  0x8d   :  { %v148_v35 = vshrl.u32 %v147_v33, 23  ;;  %v151_v49 = vand.u32 8388607, %v3153_v44 }
  0x8e   :  { %v303_v36 = vshrl.u32 %v302_v34, 23  ;;  %v306_v1 = vand.u32 8388607, %v3146_v48 }
  0x8f   :  { %v1680_v37 = vadd.s32 4294967169, %v148_v35  ;;  %v127_v38 = vpop.f32.mrf.mxu2  ;;  %v152_v3 = vor.u32 8388608, %v151_v49 }
  0x90   :  { %v1683_v39 = vadd.s32 4294967169, %v303_v36  ;;  %v140_v40 = vpop.f32.mrf.mxu3  ;;  %v103_v41 = vpop.f32.mrf.mxu0  ;;  %v2161_v13 = vadd.f32 %v127_v38, %v42_v2  ;;  %v307_v16 = vor.u32 8388608, %v306_v1 }
  0x91   :  { %v154_v42 = vadd.s32 1, %v1680_v37  ;;  %v116_v43 = vpop.f32.mrf.mxu1  ;;  %v2165_v15 = vshll.u32 %v152_v3, 8  ;;  %v2183_v28 = vadd.f32 %v140_v40, %v43_v17 }
  0x92   :  { %v309_v45 = vadd.s32 1, %v1683_v39  ;;  %v457_v24 = vand.u32 2139095040, %v2161_v13  ;;  %v2180_v27 = vshll.u32 %v307_v16, 8  ;;  %v3143_v26 = vand.u32 2147483647, %v2161_v13 }
  0x93   :  { %vm155_vm1 = vcmp.gt.s32.totalorder %v154_v42, 0  ;;  %v2178_v25 = vand.u32 65535, %v2165_v15  ;;  %v194_v40 = vshrl.u32 %v2165_v15, 16 }
  0x94   :  { %v156_v46 = vsel %vm155_vm1, %v154_v42, 0  ;;  %vm310_vm2 = vcmp.gt.s32.totalorder %v309_v45, 0  ;;  %v458_v42 = vshrl.u32 %v457_v24, 23  ;;  %v2244_v16 = vand.u32 8388607, %v3143_v26 }
  0x95   :  { %v158_v47 = vand.u32 31, %v156_v46  ;;  %v2142_v50 = vshrl.u32 %v156_v46, 5  ;;  %v311_v61 = vsel %vm310_vm2, %v309_v45, 0 }
  0x96   :  { %v313_v9 = vand.u32 31, %v311_v61  ;;  %v2190_v36 = vshrl.u32 %v311_v61, 5 }
  0x97   :  { %v159_v51 = vsub.s32 32, %v158_v47  ;;  %v164_v53 = vshll.u32 %v3154_v52, %v158_v47  ;;  %v167_v55 = vshll.u32 %v3149_v54, %v158_v47  ;;  %v129_v56 = vpop.f32.mrf.mxu2  ;;  %v170_v58 = vshll.u32 %v3147_v57, %v158_v47 }
  0x98   :  { %v173_v60 = vshll.u32 %v3151_v59, %v158_v47  ;;  %v142_v62 = vpop.f32.mrf.mxu3  ;;  %vm176_vm3 = vcmp.lt.s32.totalorder %v2142_v50, 1  ;;  %vm179_vm4 = vcmp.lt.s32.totalorder %v2142_v50, 4  ;;  %vm178_vm5 = vcmp.lt.s32.totalorder %v2142_v50, 3 }
  0x99   :  { %v165_v63 = vshrl.u32 %v3149_v54, %v159_v51  ;;  %v168_v0 = vshrl.u32 %v3147_v57, %v159_v51  ;;  %v171_v4 = vshrl.u32 %v3151_v59, %v159_v51  ;;  %v174_v6 = vshrl.u32 %v3144_v5, %v159_v51 }
  0x9a   :  { %vm177_vm6 = vcmp.lt.s32.totalorder %v2142_v50, 2  ;;  %v161_v19 = vshll.u32 %v2027_v18, %v158_v47  ;;  %v162_v20 = vshrl.u32 %v3154_v52, %v159_v51  ;;  %v314_v22 = vsub.s32 32, %v313_v9 }
  0x9b   :  { %v166_v7 = vor.u32 %v165_v63, %v164_v53  ;;  %v169_v8 = vor.u32 %v168_v0, %v167_v55  ;;  %v172_v10 = vor.u32 %v171_v4, %v170_v58  ;;  %v175_v11 = vor.u32 %v174_v6, %v173_v60 }
  0x9c   :  { %v163_v29 = vor.u32 %v162_v20, %v161_v19  ;;  %v319_v33 = vshll.u32 %v3154_v52, %v313_v9  ;;  %v320_v34 = vshrl.u32 %v3149_v54, %v314_v22  ;;  %v322_v37 = vshll.u32 %v3149_v54, %v313_v9 }
  0x9d   :  { %v188_v12 = vsel %vm176_vm3, %v166_v7, %v169_v8  ;;  %v189_v14 = vsel %vm179_vm4, %v175_v11, 1326507024  ;;  %v185_v35 = vsel %vm179_vm4, %v172_v10, 920167782  ;;  %v323_v38 = vshrl.u32 %v3147_v57, %v314_v22 }
  0x9e   :  { %v190_v21 = vsel %vm178_vm5, %v172_v10, %v189_v14  ;;  %v160_v39 = vshrl.u32 %v2027_v18, %v159_v51  ;;  %v325_v41 = vshll.u32 %v3147_v57, %v313_v9  ;;  %v181_v43 = vsel %vm179_vm4, %v169_v8, 2102212464 }
  0x9f   :  { %v2174_v23 = vsel %vm177_vm6, %v188_v12, %v190_v21  ;;  %v326_v45 = vshrl.u32 %v3151_v59, %v314_v22  ;;  %v328_v46 = vshll.u32 %v3151_v59, %v313_v9  ;;  %v329_v47 = vshrl.u32 %v3144_v5, %v314_v22 }
  0xa0   :  { %v196_v31 = vshrl.u32 %v2174_v23, 16  ;;  %v184_v49 = vsel %vm176_vm3, %v163_v29, %v166_v7  ;;  %v186_v51 = vsel %vm178_vm5, %v169_v8, %v185_v35  ;;  %v321_v55 = vor.u32 %v320_v34, %v319_v33 }
  0xa1   :  { %v324_v56 = vor.u32 %v323_v38, %v322_v37  ;;  %v327_v58 = vor.u32 %v326_v45, %v325_v41  ;;  %v330_v60 = vor.u32 %v329_v47, %v328_v46  ;;  %vm334_vm7 = vcmp.lt.s32.totalorder %v2190_v36, 4 }
  0xa2   :  { %v2209_v53 = vmul.u32 %v196_v31, %v2178_v25  ;;  %v316_v61 = vshll.u32 %v2027_v18, %v313_v9  ;;  %v317_v62 = vshrl.u32 %v3154_v52, %v314_v22  ;;  %vm331_vm8 = vcmp.lt.s32.totalorder %v2190_v36, 1 }
  0xa3   :  { %vm333_vm9 = vcmp.lt.s32.totalorder %v2190_v36, 3  ;;  %v180_v63 = vsel %vm176_vm3, %v160_v39, %v163_v29  ;;  %v182_v0 = vsel %vm178_vm5, %v166_v7, %v181_v43  ;;  %v195_v1 = vand.u32 65535, %v2174_v23 }
  0xa4   :  { %v344_v2 = vsel %vm334_vm7, %v330_v60, 1326507024  ;;  %v187_v3 = vsel %vm177_vm6, %v184_v49, %v186_v51  ;;  %v2226_v4 = vand.u32 65535, %v2180_v27  ;;  %v2229_v6 = vshrl.u32 %v2180_v27, 16 }
  0xa5   :  { %v1686_v8 = vadd.s32 4294967169, %v458_v42  ;;  %v201_v9 = vshll.u32 %v2209_v53, 16  ;;  %vm332_vm10 = vcmp.lt.s32.totalorder %v2190_v36, 2  ;;  %v343_v7 = vsel %vm331_vm8, %v321_v55, %v324_v56  ;;  %v1947_v36 = vld [vmem:[%s3137_s3 + $0x78] sm:$0xff] }
  0xa6   :  { %v345_v10 = vsel %vm333_vm9, %v327_v58, %v344_v2  ;;  %v2239_v11 = vsel %vm177_vm6, %v180_v63, %v182_v0  ;;  %v315_v12 = vshrl.u32 %v2027_v18, %v314_v22  ;;  %v318_v14 = vor.u32 %v317_v62, %v316_v61  ;;  %1037 = vmatpush.bf16.msrb.mxu1 %v1947_v36 }
  0xa7   :  { %v197_v17 = vmul.u32 %v195_v1, %v2178_v25  ;;  %v336_v19 = vsel %vm334_vm7, %v324_v56, 2102212464  ;;  %v464_v20 = vadd.s32 1, %v1686_v8  ;;  %v612_v21 = vand.u32 2139095040, %v2183_v28 }
  0xa8   :  { %v217_v24 = vand.u32 65535, %v187_v3  ;;  %v218_v29 = vshrl.u32 %v187_v3, 16  ;;  %v340_v50 = vsel %vm334_vm7, %v327_v58, 920167782  ;;  %v2254_v22 = vsel %vm332_vm10, %v343_v7, %v345_v10  ;;  %v1939_v3 = vld [vmem:[%s3137_s3 + $0x38] sm:$0xff] }
  0xa9   :  { %v2256_v33 = vmul.u32 %v195_v1, %v194_v40  ;;  %vm2258_vm11 = vc.u32 %v197_v17, %v201_v9  ;;  %v237_v35 = vmul.u32 %v2165_v15, %v2239_v11  ;;  %v3142_v37 = vand.u32 2147483647, %v2183_v28  ;;  %1024 = vmatpush.bf16.msrb.mxu0 %v1939_v3 }
  0xaa   :  { %v335_v38 = vsel %vm331_vm8, %v315_v12, %v318_v14  ;;  %v337_v39 = vsel %vm333_vm9, %v321_v55, %v336_v19  ;;  %v339_v41 = vsel %vm331_vm8, %v318_v14, %v321_v55  ;;  %vm465_vm12 = vcmp.gt.s32.totalorder %v464_v20, 0  ;;  %v1955_v12 = vld [vmem:[%s3137_s3 + $0xb8] sm:$0xff] }
  0xab   :  { %v341_v42 = vsel %vm333_vm9, %v324_v56, %v340_v50  ;;  %v351_v43 = vshrl.u32 %v2254_v22, 16  ;;  %v466_v45 = vsel %vm465_vm12, %v464_v20, 0  ;;  %v613_v46 = vshrl.u32 %v612_v21, 23  ;;  %v1963_v14 = vld [vmem:[%s3137_s3 + $0xf8] sm:$0xff]  ;;  %1050 = vmatpush.bf16.msrb.mxu2 %v1955_v12 }
  0xac   :  { %v2276_v47 = vmul.u32 %v196_v31, %v194_v40  ;;  %v2279_v49 = vmul.u32 %v217_v24, %v2178_v25  ;;  %v2282_v51 = vmul.u32 %v218_v29, %v2178_v25  ;;  %v468_v58 = vand.u32 31, %v466_v45  ;;  %1063 = vmatpush.bf16.msrb.mxu3 %v1963_v14 }
  0xad   :  { %v203_v55 = vshll.u32 %v2256_v33, 16  ;;  %v2285_v60 = vadd.s32 %v201_v9, %v197_v17  ;;  %v2287_v56 = vmul.u32 %v217_v24, %v194_v40  ;;  %v2289_v61 = vmul.u32 %v218_v29, %v194_v40  ;;  %v1938_v24 = vld [vmem:[%s3137_s3 + $0x30] sm:$0xff] }
  0xae   :  { %v2028_v62 = vmov 0   ;;  %v2296_v31 = vsel %vm332_vm10, %v335_v38, %v337_v39  ;;  %v2300_v25 = vsel %vm332_vm10, %v339_v41, %v341_v42  ;;  %v469_v63 = vsub.s32 32, %v468_v58  ;;  %v1946_v29 = vld [vmem:[%s3137_s3 + $0x70] sm:$0xff]  ;;  %1025 = vmatpush.bf16.msrb.mxu0 %v1938_v24 }
  0xaf   :  { %v206_v23 = vsel %vm2258_vm11, 1, %v2028_v62  ;;  %v2305_v0 = vmul.u32 %v351_v43, %v2226_v4  ;;  %v2307_v40 = vshrl.u32 %v466_v45, 5  ;;  %v474_v1 = vshll.u32 %v3154_v52, %v468_v58  ;;  %v1954_v39 = vld [vmem:[%s3137_s3 + $0xb0] sm:$0xff]  ;;  %1038 = vmatpush.bf16.msrb.mxu1 %v1946_v29 }
  0xb0   :  { %v1689_v2 = vadd.s32 4294967169, %v613_v46  ;;  %v475_v8 = vshrl.u32 %v3149_v54, %v469_v63  ;;  %v477_v9 = vshll.u32 %v3149_v54, %v468_v58  ;;  %v478_v7 = vshrl.u32 %v3147_v57, %v469_v63  ;;  %v1962_v41 = vld [vmem:[%s3137_s3 + $0xf0] sm:$0xff]  ;;  %1051 = vmatpush.bf16.msrb.mxu2 %v1954_v39 }
  0xb1   :  { %v480_v10 = vshll.u32 %v3147_v57, %v468_v58  ;;  %v462_v17 = vor.u32 8388608, %v2244_v16  ;;  %v481_v19 = vshrl.u32 %v3151_v59, %v469_v63  ;;  %v483_v20 = vshll.u32 %v3151_v59, %v468_v58  ;;  %1064 = vmatpush.bf16.msrb.mxu3 %v1962_v41 }
  0xb2   :  { %v484_v21 = vshrl.u32 %v3144_v5, %v469_v63  ;;  %v350_v50 = vand.u32 65535, %v2254_v22  ;;  %v372_v16 = vand.u32 65535, %v2300_v25  ;;  %v476_v34 = vor.u32 %v475_v8, %v474_v1 }
  0xb3   :  { %v479_v38 = vor.u32 %v478_v7, %v477_v9  ;;  %v472_v42 = vshrl.u32 %v3154_v52, %v469_v63  ;;  %v482_v45 = vor.u32 %v481_v19, %v480_v10  ;;  %v619_v3 = vadd.s32 1, %v1689_v2  ;;  %v1937_v2 = vld [vmem:[%s3137_s3 + $0x28] sm:$0xff] }
  0xb4   :  { %v485_v46 = vor.u32 %v484_v21, %v483_v20  ;;  %v356_v36 = vshll.u32 %v2305_v0, 16  ;;  %v471_v1 = vshll.u32 %v2027_v18, %v468_v58  ;;  %vm486_vm13 = vcmp.lt.s32.totalorder %v2307_v40, 1  ;;  %v1945_v58 = vld [vmem:[%s3137_s3 + $0x68] sm:$0xff]  ;;  %1026 = vmatpush.bf16.msrb.mxu0 %v1937_v2  ;;  %v1952_v2 = vld [vmem:[%s3137_s3 + $0xa0] sm:$0xff] }
  0xb5   :  { %vm489_vm14 = vcmp.lt.s32.totalorder %v2307_v40, 4  ;;  %vm488_vm15 = vcmp.lt.s32.totalorder %v2307_v40, 3  ;;  %v498_v8 = vsel %vm486_vm13, %v476_v34, %v479_v38  ;;  %vm620_vm1 = vcmp.gt.s32.totalorder %v619_v3, 0  ;;  %v1953_v19 = vld [vmem:[%s3137_s3 + $0xa8] sm:$0xff]  ;;  %1039 = vmatpush.bf16.msrb.mxu1 %v1945_v58  ;;  %v1960_v58 = vld [vmem:[%s3137_s3 + $0xe0] sm:$0xff] }
  0xb6   :  { %v499_v9 = vsel %vm489_vm14, %v485_v46, 1326507024  ;;  %v352_v7 = vmul.u32 %v350_v50, %v2226_v4  ;;  %v373_v10 = vshrl.u32 %v2300_v25, 16  ;;  %v621_v14 = vsel %vm620_vm1, %v619_v3, 0  ;;  %v1961_v25 = vld [vmem:[%s3137_s3 + $0xe8] sm:$0xff]  ;;  %v1936_v3 = vld [vmem:[%s3137_s3 + $0x20] sm:$0xff]  ;;  %1052 = vmatpush.bf16.msrb.mxu2 %v1953_v19 }
  0xb7   :  { %v500_v12 = vsel %vm488_vm15, %v482_v45, %v499_v9  ;;  %v2368_v20 = vadd.s32 %v206_v23, %v2276_v47  ;;  %v392_v21 = vmul.u32 %v2180_v27, %v2296_v31  ;;  %v473_v24 = vor.u32 %v472_v42, %v471_v1  ;;  %1065 = vmatpush.bf16.msrb.mxu3 %v1961_v25 }
  0xb8   :  { %vm487_vm2 = vcmp.lt.s32.totalorder %v2307_v40, 2  ;;  %v2377_v29 = vmul.u32 %v350_v50, %v2229_v6  ;;  %vm2379_vm3 = vc.u32 %v352_v7, %v356_v36  ;;  %v2387_v23 = vshll.u32 %v462_v17, 8  ;;  %1027 = vmatpush.bf16.msrb.mxu0 %v1936_v3 }
  0xb9   :  { %v2385_v47 = vsel %vm487_vm2, %v498_v8, %v500_v12  ;;  %v470_v41 = vshrl.u32 %v2027_v18, %v469_v63  ;;  %v491_v42 = vsel %vm489_vm14, %v479_v38, 2102212464  ;;  %v495_v46 = vsel %vm489_vm14, %v482_v45, 920167782  ;;  %v1944_v8 = vld [vmem:[%s3137_s3 + $0x60] sm:$0xff] }
  0xba   :  { %v623_v50 = vand.u32 31, %v621_v14  ;;  %v355_v17 = vmul.u32 %v351_v43, %v2229_v6  ;;  %v2401_v1 = vmul.u32 %v372_v16, %v2226_v4  ;;  %v2404_v63 = vmul.u32 %v373_v10, %v2226_v4  ;;  %1040 = vmatpush.bf16.msrb.mxu1 %v1944_v8  ;;  %1053 = vmatpush.bf16.msrb.mxu2 %v1952_v2 }
  0xbb   :  { %v616_v45 = vand.u32 8388607, %v3142_v37  ;;  %v361_v9 = vsel %vm2379_vm3, 1, %v2028_v62  ;;  %v2415_v22 = vmul.u32 %v372_v16, %v2229_v6  ;;  %v490_v43 = vsel %vm486_vm13, %v470_v41, %v473_v24  ;;  %1066 = vmatpush.bf16.msrb.mxu3 %v1960_v58 }
  0xbc   :  { %v506_v4 = vshrl.u32 %v2385_v47, 16  ;;  %v492_v12 = vsel %vm488_vm15, %v476_v34, %v491_v42  ;;  %v494_v16 = vsel %vm486_vm13, %v473_v24, %v476_v34  ;;  %v496_v19 = vsel %vm488_vm15, %v479_v38, %v495_v46  ;;  %v1935_v34 = vld [vmem:[%s3137_s3 + $0x18] sm:$0xff] }
  0xbd   :  { %v2432_v39 = vsub.s32 32, %v623_v50  ;;  %v358_v25 = vshll.u32 %v2377_v29, 16  ;;  %v2436_v41 = vmul.u32 %v373_v10, %v2229_v6  ;;  %v2439_v37 = vand.u32 65535, %v2387_v23  ;;  %v1943_v6 = vld [vmem:[%s3137_s3 + $0x58] sm:$0xff]  ;;  %1028 = vmatpush.bf16.msrb.mxu0 %v1935_v34 }
  0xbe   :  { %v2442_v26 = vshrl.u32 %v2387_v23, 16  ;;  %v2447_v24 = vadd.s32 %v356_v36, %v352_v7  ;;  %v2449_v38 = vadd.s32 %v361_v9, %v355_v17  ;;  %v617_v42 = vor.u32 8388608, %v616_v45  ;;  %v1951_v17 = vld [vmem:[%s3137_s3 + $0x98] sm:$0xff]  ;;  %1041 = vmatpush.bf16.msrb.mxu1 %v1943_v6 }
  0xbf   :  { %v638_v46 = vshll.u32 %v3151_v59, %v623_v50  ;;  %v2457_v10 = vsel %vm487_vm2, %v490_v43, %v492_v12  ;;  %v497_v3 = vsel %vm487_vm2, %v494_v16, %v496_v19  ;;  %v2462_v36 = vmul.u32 %v506_v4, %v2439_v37  ;;  %v1959_v45 = vld [vmem:[%s3137_s3 + $0xd8] sm:$0xff]  ;;  %1054 = vmatpush.bf16.msrb.mxu2 %v1951_v17 }
  0xc0   :  { %v2464_v7 = vshrl.u32 %v621_v14, 5  ;;  %v505_v8 = vand.u32 65535, %v2385_v47  ;;  %v629_v40 = vshll.u32 %v3154_v52, %v623_v50  ;;  %v632_v9 = vshll.u32 %v3149_v54, %v623_v50  ;;  %v1934_v47 = vld [vmem:[%s3137_s3 + $0x10] sm:$0xff]  ;;  %1067 = vmatpush.bf16.msrb.mxu3 %v1959_v45  ;;  %v1933_v45 = vld [vmem:[%s3137_s3 + $0x8] sm:$0xff] }
  0xc1   :  { %v639_v14 = vshrl.u32 %v3144_v5, %v2432_v39  ;;  %v630_v43 = vshrl.u32 %v3149_v54, %v2432_v39  ;;  %v633_v2 = vshrl.u32 %v3147_v57, %v2432_v39  ;;  %v635_v58 = vshll.u32 %v3147_v57, %v623_v50  ;;  %v1942_v57 = vld [vmem:[%s3137_s3 + $0x50] sm:$0xff]  ;;  %1029 = vmatpush.bf16.msrb.mxu0 %v1934_v47 }
  0xc2   :  { %v636_v12 = vshrl.u32 %v3151_v59, %v2432_v39  ;;  %v527_v16 = vand.u32 65535, %v497_v3  ;;  %v2489_v48 = vshll.u32 %v617_v42, 8  ;;  %v511_v54 = vshll.u32 %v2462_v36, 16  ;;  %v1950_v42 = vld [vmem:[%s3137_s3 + $0x90] sm:$0xff]  ;;  %1042 = vmatpush.bf16.msrb.mxu1 %v1942_v57  ;;  %v1957_v57 = vld [vmem:[%s3137_s3 + $0xc8] sm:$0xff] }
  0xc3   :  { %v640_v5 = vor.u32 %v639_v14, %v638_v46  ;;  %v528_v59 = vshrl.u32 %v497_v3, 16  ;;  %v626_v34 = vshll.u32 %v2027_v18, %v623_v50  ;;  %v627_v44 = vshrl.u32 %v3154_v52, %v2432_v39  ;;  %v1958_v46 = vld [vmem:[%s3137_s3 + $0xd0] sm:$0xff]  ;;  %1055 = vmatpush.bf16.msrb.mxu2 %v1950_v42 }
  0xc4   :  { %v507_v6 = vmul.u32 %v505_v8, %v2439_v37  ;;  %v2506_v14 = vmul.u32 %v505_v8, %v2442_v26  ;;  %vm641_vm4 = vcmp.lt.s32.totalorder %v2464_v7, 1  ;;  %vm644_vm5 = vcmp.lt.s32.totalorder %v2464_v7, 4  ;;  %1068 = vmatpush.bf16.msrb.mxu3 %v1958_v46  ;;  %v1940_v46 = vld [vmem:[%s3137_s3 + $0x40] sm:$0xff] }
  0xc5   :  { %v2510_v50 = vor.u32 %v630_v43, %v629_v40  ;;  %v2512_v3 = vor.u32 %v633_v2, %v632_v9  ;;  %v637_v17 = vor.u32 %v636_v12, %v635_v58  ;;  %vm209_vm6 = vc.u32 %v2285_v60, %v203_v55  ;;  %v1941_v9 = vld [vmem:[%s3137_s3 + $0x48] sm:$0xff]  ;;  %1030 = vmatpush.bf16.msrb.mxu0 %v1933_v45 }
  0xc6   :  { %v510_v8 = vmul.u32 %v506_v4, %v2442_v26  ;;  %vm642_vm7 = vcmp.lt.s32.totalorder %v2464_v7, 2  ;;  %vm643_vm8 = vcmp.lt.s32.totalorder %v2464_v7, 3  ;;  %v654_v40 = vsel %vm644_vm5, %v640_v5, 1326507024  ;;  %v1949_v55 = vld [vmem:[%s3137_s3 + $0x88] sm:$0xff]  ;;  %1043 = vmatpush.bf16.msrb.mxu1 %v1941_v9 }
  0xc7   :  { %vm2528_vm9 = vc.u32 %v507_v6, %v511_v54  ;;  %v2532_v2 = vor.u32 %v627_v44, %v626_v34  ;;  %v210_v5 = vsel %vm209_vm6, 1, %v2028_v62  ;;  %v223_v60 = vshll.u32 %v2282_v51, 16  ;;  %1056 = vmatpush.bf16.msrb.mxu2 %v1949_v55 }
  0xc8   :  { %v2543_v4 = vmul.u32 %v527_v16, %v2439_v37  ;;  %v2546_v44 = vmul.u32 %v528_v59, %v2439_v37  ;;  %v2549_v58 = vmul.u32 %v527_v16, %v2442_v26  ;;  %v2552_v12 = vmul.u32 %v528_v59, %v2442_v26  ;;  %v1932_v16 = vld [vmem:[%s3137_s3] sm:$0xff]  ;;  %1069 = vmatpush.bf16.msrb.mxu3 %v1957_v57 }
  0xc9   :  { %v513_v47 = vshll.u32 %v2506_v14, 16  ;;  %v650_v34 = vsel %vm644_vm5, %v637_v17, 920167782  ;;  %v653_v42 = vsel %vm641_vm4, %v2510_v50, %v2512_v3  ;;  %v655_v37 = vsel %vm643_vm8, %v637_v17, %v654_v40  ;;  %1031 = vmatpush.bf16.msrb.mxu0 %v1932_v16 }
  0xca   :  { %v516_v59 = vsel %vm2528_vm9, 1, %v2028_v62  ;;  %v517_v26 = vadd.s32 %v511_v54, %v507_v6  ;;  %v202_v52 = vshrl.u32 %v2209_v53, 16  ;;  %v212_v19 = vadd.s32 %v210_v5, %v2368_v20  ;;  %1044 = vmatpush.bf16.msrb.mxu1 %v1940_v46 }
  0xcb   :  { %v649_v17 = vsel %vm641_vm4, %v2532_v2, %v2510_v50  ;;  %v225_v45 = vshll.u32 %v2287_v56, 16  ;;  %vm227_vm10 = vc.u32 %v2279_v49, %v223_v60  ;;  %v229_v54 = vadd.s32 %v223_v60, %v2279_v49 }
  0xcc   :  { %v651_v6 = vsel %vm643_vm8, %v2512_v3, %v650_v34  ;;  %v2586_v53 = vsel %vm642_vm7, %v653_v42, %v655_v37  ;;  %v213_v20 = vadd.s32 %v212_v19, %v202_v52  ;;  %v228_v40 = vsel %vm227_vm10, 1, %v2028_v62 }
  0xcd   :  { %v518_v9 = vadd.s32 %v516_v59, %v510_v8  ;;  %v2591_v43 = vshrl.u32 %v2027_v18, %v2432_v39  ;;  %v230_v55 = vadd.s32 %v228_v40, %v2289_v61  ;;  %vm231_vm11 = vc.u32 %v229_v54, %v225_v45 }
  0xce   :  { %v2595_v49 = vand.u32 65535, %v2489_v48  ;;  %v2598_v57 = vshrl.u32 %v2489_v48, 16  ;;  %v204_v52 = vshrl.u32 %v2256_v33, 16  ;;  %v232_v19 = vsel %vm231_vm11, 1, %v2028_v62 }
  0xcf   :  { %v2604_v8 = vsel %vm642_vm7, %v649_v17, %v651_v6  ;;  %v661_v39 = vshrl.u32 %v2586_v53, 16  ;;  %v224_v61 = vshrl.u32 %v2282_v51, 16  ;;  %v234_v5 = vadd.s32 %v232_v19, %v230_v55 }
  0xd0   :  { %v2608_v60 = vadd.s32 %v213_v20, %v204_v52  ;;  %v226_v34 = vshrl.u32 %v2287_v56, 16  ;;  %vm364_vm12 = vc.u32 %v2447_v24, %v358_v25  ;;  %v378_v33 = vshll.u32 %v2404_v63, 16 }
  0xd1   :  { %v2615_v42 = vadd.s32 %v229_v54, %v225_v45  ;;  %v235_v37 = vadd.s32 %v234_v5, %v224_v61  ;;  %v357_v16 = vshrl.u32 %v2305_v0, 16  ;;  %v365_v59 = vsel %vm364_vm12, 1, %v2028_v62 }
  0xd2   :  { %v367_v51 = vadd.s32 %v365_v59, %v2449_v38  ;;  %v380_v46 = vshll.u32 %v2415_v22, 16  ;;  %vm382_vm13 = vc.u32 %v2401_v1, %v378_v33  ;;  %v384_v56 = vadd.s32 %v378_v33, %v2401_v1 }
  0xd3   :  { %v682_v17 = vand.u32 65535, %v2604_v8  ;;  %v683_v25 = vshrl.u32 %v2604_v8, 16  ;;  %v236_v24 = vadd.s32 %v235_v37, %v226_v34  ;;  %v383_v45 = vsel %vm382_vm13, 1, %v2028_v62 }
  0xd4   :  { %vm239_vm14 = vc.u32 %v2608_v60, %v2615_v42  ;;  %v368_v0 = vadd.s32 %v367_v51, %v357_v16  ;;  %v385_v54 = vadd.s32 %v383_v45, %v2436_v41  ;;  %vm386_vm15 = vc.u32 %v384_v56, %v380_v46 }
  0xd5   :  { %v2632_v38 = vmul.u32 %v661_v39, %v2595_v49  ;;  %v240_v1 = vadd.s32 1, %v236_v24  ;;  %v359_v6 = vshrl.u32 %v2377_v29, 16  ;;  %v387_v20 = vsel %vm386_vm15, 1, %v2028_v62 }
  0xd6   :  { %v379_v40 = vshrl.u32 %v2404_v63, 16  ;;  %v389_v55 = vadd.s32 %v387_v20, %v385_v54  ;;  %vm519_vm1 = vc.u32 %v517_v26, %v513_v47  ;;  %v533_v52 = vshll.u32 %v2546_v44, 16 }
  0xd7   :  { %v241_v19 = vsel %vm239_vm14, %v240_v1, %v236_v24  ;;  %v2638_v61 = vadd.s32 %v368_v0, %v359_v6  ;;  %v381_v41 = vshrl.u32 %v2415_v22, 16  ;;  %v520_v5 = vsel %vm519_vm1, 1, %v2028_v62 }
  0xd8   :  { %v242_v34 = vadd.s32 %v241_v19, %v237_v35  ;;  %v2645_v29 = vadd.s32 %v384_v56, %v380_v46  ;;  %v390_v33 = vadd.s32 %v389_v55, %v379_v40  ;;  %v512_v63 = vshrl.u32 %v2462_v36, 16 }
  0xd9   :  { %v522_v37 = vadd.s32 %v520_v5, %v518_v9  ;;  %v535_v47 = vshll.u32 %v2549_v58, 16  ;;  %vm537_vm2 = vc.u32 %v2543_v4, %v533_v52  ;;  %v539_v26 = vadd.s32 %v533_v52, %v2543_v4 }
  0xda   :  { %v660_v22 = vand.u32 65535, %v2586_v53  ;;  %v243_v16 = vadd.s32 536870912, %v242_v34  ;;  %v391_v59 = vadd.s32 %v390_v33, %v381_v41  ;;  %v538_v51 = vsel %vm537_vm2, 1, %v2028_v62 }
  0xdb   :  { %vm394_vm3 = vc.u32 %v2638_v61, %v2645_v29  ;;  %v523_v15 = vadd.s32 %v522_v37, %v512_v63  ;;  %v540_v11 = vadd.s32 %v538_v51, %v2552_v12  ;;  %vm541_vm6 = vc.u32 %v539_v26, %v535_v47 }
  0xdc   :  { %v2656_v35 = vshrl.u32 %v243_v16, 30  ;;  %v395_v36 = vadd.s32 1, %v391_v59  ;;  %v514_v9 = vshrl.u32 %v2506_v14, 16  ;;  %v542_v4 = vsel %vm541_vm6, 1, %v2028_v62 }
  0xdd   :  { %v666_v46 = vshll.u32 %v2632_v38, 16  ;;  %v2664_v56 = vmul.u32 %v683_v25, %v2595_v49  ;;  %v534_v24 = vshrl.u32 %v2546_v44, 16  ;;  %v544_v45 = vadd.s32 %v542_v4, %v540_v11 }
  0xde   :  { %v662_v12 = vmul.u32 %v660_v22, %v2595_v49  ;;  %v245_v0 = vshll.u32 %v2656_v35, 30  ;;  %v396_v54 = vsel %vm394_vm3, %v395_v36, %v391_v59  ;;  %v2669_v1 = vadd.s32 %v523_v15, %v514_v9 }
  0xdf   :  { %v2672_v14 = vmul.u32 %v660_v22, %v2598_v57  ;;  %v397_v6 = vadd.s32 %v396_v54, %v392_v21  ;;  %v536_v20 = vshrl.u32 %v2549_v58, 16  ;;  %v545_v40 = vadd.s32 %v544_v45, %v534_v24 }
  0xe0   :  { %v645_v44 = vsel %vm641_vm4, %v2591_v43, %v2532_v2  ;;  %v646_v55 = vsel %vm644_vm5, %v2512_v3, 2102212464  ;;  %v246_v52 = vsub.s32 %v242_v34, %v245_v0  ;;  %v2685_v19 = vadd.s32 %v539_v26, %v535_v47 }
  0xe1   :  { %vm670_vm9 = vc.u32 %v662_v12, %v666_v46  ;;  %v672_v41 = vadd.s32 %v666_v46, %v662_v12  ;;  %v398_v5 = vadd.s32 536870912, %v397_v6  ;;  %v546_v27 = vadd.s32 %v545_v40, %v536_v20 }
  0xe2   :  { %vm247_vm10 = vcmp.lt.s32.totalorder %v246_v52, 0  ;;  %v248_v31 = vsub.s32 0, %v246_v52  ;;  %vm549_vm11 = vc.u32 %v2669_v1, %v2685_v19  ;;  %v688_v21 = vshll.u32 %v2664_v56, 16 }
  0xe3   :  { %v668_v2 = vshll.u32 %v2672_v14, 16  ;;  %v684_v3 = vmul.u32 %v682_v17, %v2595_v49  ;;  %v2694_v58 = vshrl.u32 %v398_v5, 30  ;;  %v550_v43 = vadd.s32 1, %v546_v27 }
  0xe4   :  { %v665_v34 = vmul.u32 %v661_v39, %v2598_v57  ;;  %v671_v33 = vsel %vm670_vm9, 1, %v2028_v62  ;;  %v2703_v63 = vmul.u32 %v682_v17, %v2598_v57  ;;  %v249_v37 = vsel %vm247_vm10, %v248_v31, %v246_v52 }
  0xe5   :  { %v250_v47 = vclz %v249_v37  ;;  %v400_v26 = vshll.u32 %v2694_v58, 30  ;;  %v551_v22 = vsel %vm549_vm11, %v550_v43, %v546_v27  ;;  %vm674_vm4 = vc.u32 %v672_v41, %v668_v2 }
  0xe6   :  { %v647_v49 = vsel %vm643_vm8, %v2510_v50, %v646_v55  ;;  %v687_v53 = vmul.u32 %v683_v25, %v2598_v57  ;;  %v3162_v39 = vmul.u32 %v2387_v23, %v2457_v10  ;;  %vm692_vm5 = vc.u32 %v684_v3, %v688_v21 }
  0xe7   :  { %v673_v17 = vadd.s32 %v671_v33, %v665_v34  ;;  %v238_v59 = vadd.s32 %v2615_v42, %v2608_v60  ;;  %v1681_v51 = vadd.s32 4294967294, %v250_v47  ;;  %v401_v15 = vsub.s32 %v397_v6, %v400_v26 }
  0xe8   :  { %v552_v16 = vadd.s32 %v551_v22, %v3162_v39  ;;  %v675_v36 = vsel %vm674_vm4, 1, %v2028_v62  ;;  %v690_v50 = vshll.u32 %v2703_v63, 16  ;;  %v694_v9 = vadd.s32 %v688_v21, %v684_v3 }
  0xe9   :  { %vm1682_vm8 = vcmp.lt.s32.totalorder %v1681_v51, 0  ;;  %vm402_vm12 = vcmp.lt.s32.totalorder %v401_v15, 0  ;;  %v403_v57 = vsub.s32 0, %v401_v15  ;;  %v693_v8 = vsel %vm692_vm5, 1, %v2028_v62 }
  0xea   :  { %v553_v11 = vadd.s32 536870912, %v552_v16  ;;  %v253_v23 = vsel %vm1682_vm8, 0, %v1681_v51  ;;  %v667_v25 = vshrl.u32 %v2632_v38, 16  ;;  %vm696_vm13 = vc.u32 %v694_v9, %v690_v50 }
  0xeb   :  { %v254_v60 = vsub.s32 32, %v253_v23  ;;  %v258_v42 = vsub.s32 4294967266, %v253_v23  ;;  %v404_v4 = vsel %vm402_vm12, %v403_v57, %v401_v15  ;;  %v677_v46 = vadd.s32 %v675_v36, %v673_v17 }
  0xec   :  { %v2720_v10 = vshrl.u32 %v553_v11, 30  ;;  %v268_v24 = vsub.s32 4, %v2656_v35  ;;  %v405_v45 = vclz %v404_v4  ;;  %v695_v0 = vadd.s32 %v693_v8, %v687_v53  ;;  %v1956_v4 = vld [vmem:[%s3137_s3 + $0xc0] sm:$0xff] }
  0xed   :  { %v255_v54 = vshll.u32 %v246_v52, %v253_v23  ;;  %v256_v6 = vshrl.u32 %v238_v59, %v254_v60  ;;  %v259_v20 = vadd.s32 127, %v258_v42  ;;  %v697_v40 = vsel %vm696_vm13, 1, %v2028_v62  ;;  %v1948_v42 = vld [vmem:[%s3137_s3 + $0x80] sm:$0xff]  ;;  %1070 = vmatpush.bf16.msrb.mxu3 %v1956_v4 }
  0xee   :  { %v555_v12 = vshll.u32 %v2720_v10, 30  ;;  %vm146_vm14 = vcmp.lt.s32.totalorder %v2132_v30, 0  ;;  %v648_v38 = vsel %vm642_vm7, %v645_v44, %v647_v49  ;;  %v393_v55 = vadd.s32 %v2645_v29, %v2638_v61  ;;  %1057 = vmatpush.bf16.msrb.mxu2 %v1948_v42 }
  0xef   :  { %v1684_v41 = vadd.s32 4294967294, %v405_v45  ;;  %v257_v5 = vor.u32 %v256_v6, %v255_v54  ;;  %v260_v27 = vshll.u32 %v259_v20, 23  ;;  %v678_v21 = vadd.s32 %v677_v46, %v667_v25 }
  0xf0   :  { %v2731_v31 = vsub.s32 %v552_v16, %v555_v12  ;;  %v269_v52 = vsel %vm146_vm14, %v268_v24, %v2656_v35  ;;  %v669_v2 = vshrl.u32 %v2672_v14, 16  ;;  %v699_v3 = vadd.s32 %v697_v40, %v695_v0 }
  0xf1   :  { %vm1685_vm15 = vcmp.lt.s32.totalorder %v1684_v41, 0  ;;  %v261_v43 = vor.u32 4788187, %v260_v27  ;;  %v689_v61 = vshrl.u32 %v2664_v56, 16  ;;  %v691_v33 = vshrl.u32 %v2703_v63, 16 }
  0xf2   :  { %v408_v7 = vsel %vm1685_vm15, 0, %v1684_v41  ;;  %vm557_vm7 = vcmp.lt.s32.totalorder %v2731_v31, 0  ;;  %v558_v34 = vsub.s32 0, %v2731_v31  ;;  %v264_v47 = vcvt.s32.f32 %v257_v5 }
  0xf3   :  { %v409_v29 = vsub.s32 32, %v408_v7  ;;  %v413_v44 = vsub.s32 4294967266, %v408_v7  ;;  %v262_v37 = vand.u32 2147483647, %v261_v43  ;;  %v2741_v26 = vadd.s32 %v678_v21, %v669_v2 }
  0xf4   :  { %v700_v35 = vadd.s32 %v699_v3, %v689_v61  ;;  %v410_v22 = vshll.u32 %v401_v15, %v408_v7  ;;  %v559_v53 = vsel %vm557_vm7, %v558_v34, %v2731_v31  ;;  %v2744_v17 = vadd.s32 %v694_v9, %v690_v50 }
  0xf5   :  { %v411_v14 = vshrl.u32 %v393_v55, %v409_v29  ;;  %v414_v49 = vadd.s32 127, %v413_v44  ;;  %v265_v39 = vmul.f32 %v264_v47, %v262_v37  ;;  %v560_v16 = vclz %v559_v53 }
  0xf6   :  { %v701_v56 = vadd.s32 %v700_v35, %v691_v33  ;;  %vm301_vm1 = vcmp.lt.s32.totalorder %v2134_v32, 0  ;;  %v3163_v63 = vand.u32 2147483647, %v2132_v30  ;;  %vm704_vm3 = vc.u32 %v2741_v26, %v2744_v17 }
  0xf7   :  { %v412_v59 = vor.u32 %v411_v14, %v410_v22  ;;  %v415_v51 = vshll.u32 %v414_v49, 23  ;;  %v266_v15 = vxor.u32 2147483648, %v265_v39  ;;  %v1687_v36 = vadd.s32 4294967294, %v560_v16 }
  0xf8   :  { %vm2749_vm2 = vcmp.le.f32.partialorder %v3163_v63, 0.7853982  ;;  %v702_v57 = vmul.u32 %v2489_v48, %v648_v38  ;;  %v705_v8 = vadd.s32 1, %v701_v56  ;;  %v423_v60 = vsub.s32 4, %v2694_v58 }
  0xf9   :  { %v271_v50 = vsel %vm2749_vm2, 0, %v269_v52  ;;  %v416_v9 = vor.u32 4788187, %v415_v51  ;;  %v267_v23 = vsel %vm146_vm14, %v266_v15, %v265_v39  ;;  %v419_v25 = vcvt.s32.f32 %v412_v59 }
  0xfa   :  { %vm1688_vm6 = vcmp.lt.s32.totalorder %v1687_v36, 0  ;;  %v2770_v48 = vsel %vm2749_vm2, %v2132_v30, %v267_v23  ;;  %v706_v45 = vsel %vm704_vm3, %v705_v8, %v701_v56  ;;  %v548_v0 = vadd.s32 %v2685_v19, %v2669_v1 }
  0xfb   :  { %v417_v46 = vand.u32 2147483647, %v416_v9  ;;  %v563_v24 = vsel %vm1688_vm6, 0, %v1687_v36  ;;  %v272_v12 = vmul.f32 %v2770_v48, %v2770_v48  ;;  %v288_v20 = vadd.s32 3, %v271_v50 }
  0xfc   :  { %v564_v54 = vsub.s32 32, %v563_v24  ;;  %v568_v6 = vsub.s32 4294967266, %v563_v24  ;;  %v565_v38 = vshll.u32 %v2731_v31, %v563_v24  ;;  %v707_v55 = vadd.s32 %v706_v45, %v702_v57 }
  0xfd   :  { %v420_v40 = vmul.f32 %v419_v25, %v417_v46  ;;  %v273_v41 = vmul.f32 -0.001358992, %v272_v12  ;;  %v280_v5 = vmul.f32 -0.00019511016, %v272_v12  ;;  %v424_v2 = vsel %vm301_vm1, %v423_v60, %v2694_v58 }
  0xfe   :  { %v566_v27 = vshrl.u32 %v548_v0, %v564_v54  ;;  %v569_v21 = vadd.s32 127, %v568_v6  ;;  %v708_v3 = vadd.s32 536870912, %v707_v55  ;;  %vm456_vm9 = vcmp.lt.s32.totalorder %v2161_v13, 0 }
  0xff   :  { %v421_v52 = vxor.u32 2147483648, %v420_v40  ;;  %v274_v43 = vadd.f32 0.041655596, %v273_v41  ;;  %v281_v7 = vadd.f32 0.008332121, %v280_v5  ;;  %v289_v61 = vand.u32 3, %v288_v20 }
 0x100   :  { %v567_v1 = vor.u32 %v566_v27, %v565_v38  ;;  %v570_v19 = vshll.u32 %v569_v21, 23  ;;  %v3166_v31 = vand.u32 2147483647, %v2134_v32  ;;  %v2789_v34 = vshrl.u32 %v708_v3, 30 }
 0x101   :  { %v422_v44 = vsel %vm301_vm1, %v421_v52, %v420_v40  ;;  %v275_v58 = vmul.f32 %v274_v43, %v272_v12  ;;  %v282_v33 = vmul.f32 %v281_v7, %v272_v12  ;;  %v3169_v14 = vand.u32 2147483647, %v2161_v13 }
 0x102   :  { %vm2783_vm10 = vcmp.le.f32.partialorder %v3166_v31, 0.7853982  ;;  %v571_v47 = vor.u32 4788187, %v570_v19  ;;  %v710_v53 = vshll.u32 %v2789_v34, 30  ;;  %v574_v59 = vcvt.s32.f32 %v567_v1 }
 0x103   :  { %v425_v37 = vsel %vm2783_vm10, %v2134_v32, %v422_v44  ;;  %v426_v35 = vsel %vm2783_vm10, 0, %v424_v2  ;;  %vm2798_vm11 = vcmp.le.f32.partialorder %v3169_v14, 0.7853982  ;;  %v276_v39 = vadd.f32 -0.4999988, %v275_v58 }
 0x104   :  { %v427_v22 = vmul.f32 %v425_v37, %v425_v37  ;;  %v283_v16 = vadd.f32 -0.16666654, %v282_v33  ;;  %v572_v56 = vand.u32 2147483647, %v571_v47  ;;  %vm291_vm4 = vcmp.eq.s32.totalorder %v289_v61, 0 }
 0x105   :  { %v2803_v11 = vsub.s32 %v707_v55, %v710_v53  ;;  %v277_v15 = vmul.f32 %v276_v39, %v272_v12  ;;  %vm290_vm5 = vcmp.lt.s32.totalorder %v289_v61, 2  ;;  %v443_v57 = vadd.s32 3, %v426_v35 }
 0x106   :  { %v428_v51 = vmul.f32 -0.001358992, %v427_v22  ;;  %v435_v63 = vmul.f32 -0.00019511016, %v427_v22  ;;  %v284_v36 = vmul.f32 %v283_v16, %v272_v12  ;;  %v575_v50 = vmul.f32 %v574_v59, %v572_v56 }
 0x107   :  { %vm287_vm8 = vweird.f32 %v2132_v30  ;;  %vm712_vm12 = vcmp.lt.s32.totalorder %v2803_v11, 0  ;;  %v713_v23 = vsub.s32 0, %v2803_v11  ;;  %v278_v25 = vadd.f32 1.0, %v277_v15 }
 0x108   :  { %v429_v9 = vadd.f32 0.041655596, %v428_v51  ;;  %v436_v8 = vadd.f32 0.008332121, %v435_v63  ;;  %v285_v60 = vadd.f32 1.0, %v284_v36  ;;  %v576_v42 = vxor.u32 2147483648, %v575_v50 }
 0x109   :  { %v578_v4 = vsub.s32 4, %v2720_v10  ;;  %vm294_vm13 = vcmp.eq.s32.totalorder %v289_v61, 2  ;;  %v714_v45 = vsel %vm712_vm12, %v713_v23, %v2803_v11  ;;  %v295_v0 = vxor.u32 2147483648, %v278_v25 }
 0x10a   :  { %v430_v46 = vmul.f32 %v429_v9, %v427_v22  ;;  %v437_v24 = vmul.f32 %v436_v8, %v427_v22  ;;  %v286_v12 = vmul.f32 %v285_v60, %v2770_v48  ;;  %v577_v54 = vsel %vm456_vm9, %v576_v42, %v575_v50 }
 0x10b   :  { %v715_v6 = vclz %v714_v45  ;;  %v444_v38 = vand.u32 3, %v443_v57  ;;  %v580_v55 = vsel %vm2798_vm11, %v2161_v13, %v577_v54  ;;  %v579_v5 = vsel %vm456_vm9, %v578_v4, %v2720_v10 }
 0x10c   :  { %v431_v20 = vadd.f32 -0.4999988, %v430_v46  ;;  %v438_v40 = vadd.f32 -0.16666654, %v437_v24  ;;  %v292_v41 = vxor.u32 2147483648, %v286_v12  ;;  %v582_v27 = vmul.f32 %v580_v55, %v580_v55 }
 0x10d   :  { %v1690_v21 = vadd.s32 4294967294, %v715_v6  ;;  %v296_v48 = vsel %vm294_vm13, %v295_v0, %v286_v12  ;;  %v703_v3 = vadd.s32 %v2744_v17, %v2741_v26  ;;  %vm442_vm14 = vweird.f32 %v2134_v32 }
 0x10e   :  { %v432_v52 = vmul.f32 %v431_v20, %v427_v22  ;;  %v439_v2 = vmul.f32 %v438_v40, %v427_v22  ;;  %v293_v43 = vsel %vm291_vm4, %v278_v25, %v292_v41  ;;  %v583_v7 = vmul.f32 -0.001358992, %v582_v27 }
 0x10f   :  { %v590_v1 = vmul.f32 -0.00019511016, %v582_v27  ;;  %vm1691_vm15 = vcmp.lt.s32.totalorder %v1690_v21, 0  ;;  %v297_v19 = vsel %vm290_vm5, %v293_v43, %v296_v48  ;;  %v581_v22 = vsel %vm2798_vm11, 0, %v579_v5 }
 0x110   :  { %v433_v31 = vadd.f32 1.0, %v432_v52  ;;  %v440_v10 = vadd.f32 1.0, %v439_v2  ;;  %v718_v29 = vsel %vm1691_vm15, 0, %v1690_v21  ;;  %v298_v44 = vsel %vm287_vm8, nan, %v297_v19 }
 0x111   :  { %v584_v58 = vadd.f32 0.041655596, %v583_v7  ;;  %v591_v33 = vadd.f32 0.008332121, %v590_v1  ;;  %v719_v47 = vsub.s32 32, %v718_v29  ;;  %v764_v35 = vpack.c.bf16 %v298_v44, %v298_v44 }
 0x112   :  { %v441_v26 = vmul.f32 %v440_v10, %v425_v37  ;;  %v450_v17 = vxor.u32 2147483648, %v433_v31  ;;  %v723_v61 = vsub.s32 4294967266, %v718_v29  ;;  %vm445_vm7 = vcmp.lt.s32.totalorder %v444_v38, 2 }
 0x113   :  { %v585_v14 = vmul.f32 %v584_v58, %v582_v27  ;;  %v592_v53 = vmul.f32 %v591_v33, %v582_v27  ;;  %v721_v39 = vshrl.u32 %v703_v3, %v719_v47  ;;  %1032 = vmatmul.bf16.vlgmr.msrb.gmra.mxu0 %v764_v35  ;;  %vm446_vm1 = vcmp.eq.s32.totalorder %v444_v38, 0 }
 0x114   :  { %v447_v16 = vxor.u32 2147483648, %v441_v26  ;;  %v720_v30 = vshll.u32 %v2803_v11, %v718_v29  ;;  %vm449_vm2 = vcmp.eq.s32.totalorder %v444_v38, 2  ;;  %v724_v51 = vadd.s32 127, %v723_v61 }
 0x115   :  { %v586_v56 = vadd.f32 -0.4999988, %v585_v14  ;;  %v593_v59 = vadd.f32 -0.16666654, %v592_v53  ;;  %v451_v37 = vsel %vm449_vm2, %v450_v17, %v441_v26  ;;  %v598_v15 = vadd.s32 3, %v581_v22 }
 0x116   :  { %v448_v63 = vsel %vm446_vm1, %v433_v31, %v447_v16  ;;  %v722_v36 = vor.u32 %v721_v39, %v720_v30  ;;  %v725_v9 = vshll.u32 %v724_v51, 23  ;;  %vm611_vm10 = vcmp.lt.s32.totalorder %v2183_v28, 0  ;;  %v1846_v16 = vld [vmem:[%s3138_s4 + $0x30] sm:$0xf]  ;;  %v1971_v30 = vld [vmem:[%s3138_s4 + $0x34] sm:$0xf0] }
 0x117   :  { %v452_v49 = vsel %vm445_vm7, %v448_v63, %v451_v37  ;;  %v587_v57 = vmul.f32 %v586_v56, %v582_v27  ;;  %v594_v50 = vmul.f32 %v593_v59, %v582_v27  ;;  %v599_v11 = vand.u32 3, %v598_v15  ;;  %v1970_v56 = vld [vmem:[%s3138_s4 + $0x34] sm:$0xf]  ;;  %v1838_v51 = vld [vmem:[%s3138_s4 + $0x20] sm:$0xf] }
 0x118   :  { %v453_v8 = vsel %vm442_vm14, nan, %v452_v49  ;;  %v726_v42 = vor.u32 4788187, %v725_v9  ;;  %v729_v45 = vcvt.s32.f32 %v722_v36  ;;  %vm597_vm11 = vweird.f32 %v2161_v13  ;;  %v1969_v63 = vld [vmem:[%s3138_s4 + $0x24] sm:$0xf0] }
 0x119   :  { %v765_v23 = vpack.c.bf16 %v453_v8, %v453_v8  ;;  %v588_v25 = vadd.f32 1.0, %v587_v57  ;;  %v595_v60 = vadd.f32 1.0, %v594_v50  ;;  %vm601_vm3 = vcmp.eq.s32.totalorder %v599_v11, 0  ;;  %v1968_v15 = vld [vmem:[%s3138_s4 + $0x24] sm:$0xf] }
 0x11a   :  { %v727_v24 = vand.u32 2147483647, %v726_v42  ;;  %vm604_vm6 = vcmp.eq.s32.totalorder %v599_v11, 2  ;;  %vm600_vm9 = vcmp.lt.s32.totalorder %v599_v11, 2  ;;  %v3172_v38 = vand.u32 2147483647, %v2183_v28 }
 0x11b   :  { %1045 = vmatmul.bf16.vlgmr.msrb.gmra.mxu1 %v765_v23  ;;  %v596_v4 = vmul.f32 %v595_v60, %v580_v55  ;;  %v605_v46 = vxor.u32 2147483648, %v588_v25  ;;  %v733_v27 = vsub.s32 4, %v2789_v34  ;;  %vm752_vm13 = vweird.f32 %v2183_v28  ;;  %v1840_v36 = vld [vmem:[%s3138_s4 + $0x28] sm:$0xf0]  ;;  %v1830_v50 = vld [vmem:[%s3138_s4 + $0x10] sm:$0xf] }
 0x11c   :  { %v730_v0 = vmul.f32 %v729_v45, %v727_v24  ;;  %vm2836_vm4 = vcmp.le.f32.partialorder %v3172_v38, 0.7853982  ;;  %v1847_v59 = vor.u32 %v1971_v30, %v1846_v16  ;;  %v1839_v49 = vor.u32 %v1969_v63, %v1838_v51  ;;  %v1967_v9 = vld [vmem:[%s3138_s4 + $0x14] sm:$0xf0]  ;;  %v1966_v8 = vld [vmem:[%s3138_s4 + $0x14] sm:$0xf] }
 0x11d   :  { %v602_v12 = vxor.u32 2147483648, %v596_v4  ;;  %v606_v6 = vsel %vm604_vm6, %v605_v46, %v596_v4  ;;  %v734_v2 = vsel %vm611_vm10, %v733_v27, %v2789_v34  ;;  %v1843_v57 = vor.u32 %v1968_v15, %v1840_v36  ;;  %v1822_v24 = vld [vmem:[%s3138_s4] sm:$0xf]  ;;  %v1965_v45 = vld [vmem:[%s3138_s4 + $0x4] sm:$0xf0] }
 0x11e   :  { %v731_v20 = vxor.u32 2147483648, %v730_v0  ;;  %v736_v7 = vsel %vm2836_vm4, 0, %v734_v2  ;;  %1139 = vmatpush.bf16.msra.mxu0 %v1847_v59  ;;  %v1831_v23 = vor.u32 %v1967_v9, %v1830_v50  ;;  %vm1131_vm14 = vcmask 523264  }
 0x11f   :  { %v603_v54 = vsel %vm601_vm3, %v588_v25, %v602_v12  ;;  %v753_v29 = vadd.s32 3, %v736_v7  ;;  %v1832_v25 = vld [vmem:[%s3138_s4 + $0x18] sm:$0xf0]  ;;  %v1964_v12 = vld [vmem:[%s3138_s4 + $0x4] sm:$0xf] }
 0x120   :  { %v607_v32 = vsel %vm600_vm9, %v603_v54, %v606_v6  ;;  %v732_v41 = vsel %vm611_vm10, %v731_v20, %v730_v0  ;;  %v1835_v60 = vor.u32 %v1966_v8, %v1832_v25  ;;  %v1823_v0 = vor.u32 %v1965_v45, %v1822_v24  ;;  %v1824_v54 = vld [vmem:[%s3138_s4 + $0x8] sm:$0xf0] }
 0x121   :  { %v608_v40 = vsel %vm597_vm11, nan, %v607_v32  ;;  %v735_v21 = vsel %vm2836_vm4, %v2183_v28, %v732_v41  ;;  %v754_v35 = vand.u32 3, %v753_v29  ;;  %v1848_v28 = vld [vmem:[%s3138_s4 + $0x38] sm:$0xf0]  ;;  %v1827_v6 = vor.u32 %v1964_v12, %v1824_v54 }
 0x122   :  { %v766_v5 = vpack.c.bf16 %v608_v40, %v608_v40  ;;  %v737_v48 = vmul.f32 %v735_v21, %v735_v21  ;;  %v1851_v37 = vor.u32 %v1970_v56, %v1848_v28  ;;  %1140 = vmatpush.bf16.msra.mxu0 %v1839_v49  ;;  %v3177_v8 = vmov 2102212464  }
 0x123   :  { %vm756_vm5 = vcmp.eq.s32.totalorder %v754_v35, 0  ;;  %vm759_vm8 = vcmp.eq.s32.totalorder %v754_v35, 2  ;;  %vm755_vm12 = vcmp.lt.s32.totalorder %v754_v35, 2 }
 0x124   :  { %1058 = vmatmul.bf16.vlgmr.msrb.gmra.mxu2 %v766_v5  ;;  %v738_v52 = vmul.f32 -0.001358992, %v737_v48  ;;  %v745_v13 = vmul.f32 -0.00019511016, %v737_v48  ;;  %1152 = vmatpush.bf16.msra.mxu1 %v1851_v37  ;;  %v3175_v37 = vmov 2475754826  }
 0x126   :  { %v739_v3 = vadd.f32 0.041655596, %v738_v52  ;;  %v746_v43 = vadd.f32 0.008332121, %v745_v13  ;;  %1141 = vmatpush.bf16.msra.mxu0 %v1831_v23 }
 0x128   :  { %v740_v1 = vmul.f32 %v739_v3, %v737_v48  ;;  %v747_v19 = vmul.f32 %v746_v43, %v737_v48  ;;  %1153 = vmatpush.bf16.msra.mxu1 %v1843_v57  ;;  %v3176_v57 = vmov 2131351028  }
 0x12a   :  { %v741_v31 = vadd.f32 -0.4999988, %v740_v1  ;;  %v748_v10 = vadd.f32 -0.16666654, %v747_v19  ;;  %1142 = vmatpush.bf16.msra.mxu0 %v1823_v0 }
 0x12c   :  { %v742_v44 = vmul.f32 %v741_v31, %v737_v48  ;;  %v749_v58 = vmul.f32 %v748_v10, %v737_v48  ;;  %1154 = vmatpush.bf16.msra.mxu1 %v1835_v60  ;;  %v3178_v60 = vmov 920167782  }
 0x12e   :  { %v743_v33 = vadd.f32 1.0, %v742_v44  ;;  %v750_v47 = vadd.f32 1.0, %v749_v58 }
 0x130   :  { %v751_v26 = vmul.f32 %v750_v47, %v735_v21  ;;  %v760_v17 = vxor.u32 2147483648, %v743_v33  ;;  %1155 = vmatpush.bf16.msra.mxu1 %v1827_v6  ;;  %v1085_v21 = vld [vmem:[%s3139_s5] sm:$0x3] }
 0x131   :  { %v1087_v48 = vperm.slane %v1085_v21, 0  ;;  %v1088_v52 = vperm.slane %v1085_v21, 1 }
 0x132   :  { %v757_v22 = vxor.u32 2147483648, %v751_v26  ;;  %v761_v14 = vsel %vm759_vm8, %v760_v17, %v751_v26 }
 0x134   :  { %v758_v34 = vsel %vm756_vm5, %v743_v33, %v757_v22 }
 0x135   :  { %v762_v53 = vsel %vm755_vm12, %v758_v34, %v761_v14 }
 0x136   :  { %v763_v39 = vsel %vm752_vm13, nan, %v762_v53 }
 0x137   :  { %v767_v61 = vpack.c.bf16 %v763_v39, %v763_v39 }
 0x139   :  { %1071 = vmatmul.bf16.vlgmr.msrb.gmra.mxu3 %v767_v61 }
 0x190   :  { %v1033_v42 = vpop.f32.mrf.mxu0 }
 0x198   :  { %v1046_v11 = vpop.f32.mrf.mxu1  ;;  %v1035_v4 = vpop.f32.mrf.mxu0 }
 0x199   :  { %v1047_v40 = vadd.f32 %v1046_v11, %v1033_v42  ;;  %v3179_v4 = vmov 1326507024  }
 0x1a0   :  { %v1048_v46 = vpop.f32.mrf.mxu1 }
 0x1a7   :  { %v1059_v20 = vpop.f32.mrf.mxu2 }
 0x1a8   :  { %v1060_v38 = vadd.f32 %v1059_v20, %v1047_v40 }
 0x1af   :  { %v1061_v32 = vpop.f32.mrf.mxu2 }
 0x1bc   :  { %v1072_v55 = vpop.f32.mrf.mxu3 }
 0x1bd   :  { %v1073_v41 = vadd.f32 %v1072_v55, %v1060_v38 }
 0x1bf   :  { %v1076_v5 = vpack.c.bf16 %v1073_v41, %v1073_v41 }
 0x1c1   :  { %1852 = vmatmul.msk.bf16.vlgmr.msra.gmra.mxu0 %vm1131_vm14, %v1076_v5  ;;  %1853 = vmatmul.msk.bf16.vlgmr.msra.gmra.mxu1 %vm1131_vm14, %v1076_v5 }
 0x1c4   :  { %v1074_v27 = vpop.f32.mrf.mxu3 }
 0x23e   :  { %v1144_v13 = vpop.f32.mrf.mxu0  ;;  %v1157_v2 = vpop.f32.mrf.mxu1 }
 0x23f   :  { %v2899_v3 = vadd.f32 %v1144_v13, %v1087_v48  ;;  %v2901_v43 = vadd.f32 %v1157_v2, %v1088_v52 }
 0x241   :  { %v1161_v7 = vand.u32 2147483647, %v2899_v3  ;;  %v1164_v1 = vand.u32 2139095040, %v2899_v3  ;;  %v1316_v19 = vand.u32 2147483647, %v2901_v43  ;;  %v1319_v31 = vand.u32 2139095040, %v2901_v43 }
 0x243   :  { %v1165_v10 = vshrl.u32 %v1164_v1, 23  ;;  %v1168_v29 = vand.u32 8388607, %v1161_v7  ;;  %v1320_v44 = vshrl.u32 %v1319_v31, 23  ;;  %v1323_v47 = vand.u32 8388607, %v1316_v19 }
 0x245   :  { %v1854_v58 = vadd.s32 4294967169, %v1165_v10  ;;  %v1169_v33 = vor.u32 8388608, %v1168_v29  ;;  %v1857_v35 = vadd.s32 4294967169, %v1320_v44  ;;  %v1324_v53 = vor.u32 8388608, %v1323_v47 }
 0x246   :  { %v1146_v26 = vpop.f32.mrf.mxu0  ;;  %v1159_v17 = vpop.f32.mrf.mxu1 }
 0x247   :  { %v1171_v22 = vadd.s32 1, %v1854_v58  ;;  %v1326_v34 = vadd.s32 1, %v1857_v35  ;;  %v2911_v14 = vshll.u32 %v1169_v33, 8  ;;  %v2916_v28 = vshll.u32 %v1324_v53, 8 }
 0x249   :  { %vm1172_vm15 = vcmp.gt.s32.totalorder %v1171_v22, 0  ;;  %vm1327_vm7 = vcmp.gt.s32.totalorder %v1326_v34, 0  ;;  %v1210_v56 = vand.u32 65535, %v2911_v14  ;;  %v1211_v36 = vshrl.u32 %v2911_v14, 16 }
 0x24a   :  { %v1173_v39 = vsel %vm1172_vm15, %v1171_v22, 0  ;;  %v1328_v16 = vsel %vm1327_vm7, %v1326_v34, 0 }
 0x24b   :  { %v1175_v61 = vand.u32 31, %v1173_v39  ;;  %v2914_v59 = vand.u32 31, %v1328_v16  ;;  %v2918_v51 = vshrl.u32 %v1173_v39, 5  ;;  %v2963_v47 = vshrl.u32 %v1328_v16, 5 }
 0x24d   :  { %v1176_v30 = vsub.s32 32, %v1175_v61  ;;  %v1178_v63 = vshll.u32 %v2027_v18, %v1175_v61  ;;  %v1181_v15 = vshll.u32 %v3175_v37, %v1175_v61  ;;  %v1184_v9 = vshll.u32 %v3176_v57, %v1175_v61 }
 0x24e   :  { %v1187_v25 = vshll.u32 %v3177_v8, %v1175_v61  ;;  %v1190_v11 = vshll.u32 %v3178_v60, %v1175_v61  ;;  %v2932_v0 = vsub.s32 32, %v2914_v59  ;;  %vm1193_vm1 = vcmp.lt.s32.totalorder %v2918_v51, 1 }
 0x24f   :  { %v1179_v49 = vshrl.u32 %v3175_v37, %v1176_v30  ;;  %v1182_v50 = vshrl.u32 %v3176_v57, %v1176_v30  ;;  %v1185_v23 = vshrl.u32 %v3177_v8, %v1176_v30  ;;  %v1188_v42 = vshrl.u32 %v3178_v60, %v1176_v30 }
 0x250   :  { %v1191_v46 = vshrl.u32 %v3179_v4, %v1176_v30  ;;  %vm1194_vm2 = vcmp.lt.s32.totalorder %v2918_v51, 2  ;;  %v1177_v20 = vshrl.u32 %v2027_v18, %v1176_v30  ;;  %vm1196_vm3 = vcmp.lt.s32.totalorder %v2918_v51, 4 }
 0x251   :  { %v1180_v24 = vor.u32 %v1179_v49, %v1178_v63  ;;  %v1183_v45 = vor.u32 %v1182_v50, %v1181_v15  ;;  %v1186_v12 = vor.u32 %v1185_v23, %v1184_v9  ;;  %v1189_v54 = vor.u32 %v1188_v42, %v1187_v25 }
 0x252   :  { %v1192_v6 = vor.u32 %v1191_v46, %v1190_v11  ;;  %vm1195_vm6 = vcmp.lt.s32.totalorder %v2918_v51, 3  ;;  %v1333_v41 = vshll.u32 %v2027_v18, %v2914_v59  ;;  %v1334_v48 = vshrl.u32 %v3175_v37, %v2932_v0 }
 0x253   :  { %v1201_v32 = vsel %vm1193_vm1, %v1180_v24, %v1183_v45  ;;  %v1205_v40 = vsel %vm1193_vm1, %v1183_v45, %v1186_v12  ;;  %v1202_v38 = vsel %vm1196_vm3, %v1189_v54, 920167782  ;;  %v1198_v5 = vsel %vm1196_vm3, %v1186_v12, 2102212464 }
 0x254   :  { %v1206_v55 = vsel %vm1196_vm3, %v1192_v6, 1326507024  ;;  %v1203_v27 = vsel %vm1195_vm6, %v1186_v12, %v1202_v38  ;;  %v1336_v2 = vshll.u32 %v3175_v37, %v2914_v59  ;;  %v1337_v1 = vshrl.u32 %v3176_v57, %v2932_v0 }
 0x255   :  { %v1207_v21 = vsel %vm1195_vm6, %v1189_v54, %v1206_v55  ;;  %v1204_v52 = vsel %vm1194_vm2, %v1201_v32, %v1203_v27  ;;  %v1197_v58 = vsel %vm1193_vm1, %v1177_v20, %v1180_v24  ;;  %v1199_v33 = vsel %vm1195_vm6, %v1183_v45, %v1198_v5 }
 0x256   :  { %v1208_v13 = vsel %vm1194_vm2, %v1205_v40, %v1207_v21  ;;  %v1234_v29 = vand.u32 65535, %v1204_v52  ;;  %v1235_v44 = vshrl.u32 %v1204_v52, 16  ;;  %v2965_v35 = vor.u32 %v1334_v48, %v1333_v41 }
 0x257   :  { %v1212_v31 = vand.u32 65535, %v1208_v13  ;;  %v1213_v10 = vshrl.u32 %v1208_v13, 16  ;;  %v2967_v22 = vor.u32 %v1337_v1, %v1336_v2  ;;  %v1340_v34 = vshrl.u32 %v3177_v8, %v2932_v0 }
 0x258   :  { %v1237_v39 = vmul.u32 %v1235_v44, %v1210_v56  ;;  %v1238_v61 = vmul.u32 %v1234_v29, %v1211_v36  ;;  %v1339_v30 = vshll.u32 %v3176_v57, %v2914_v59  ;;  %v1236_v15 = vmul.u32 %v1234_v29, %v1210_v56 }
 0x259   :  { %v1215_v26 = vmul.u32 %v1213_v10, %v1210_v56  ;;  %v1216_v17 = vmul.u32 %v1212_v31, %v1211_v36  ;;  %v1214_v53 = vmul.u32 %v1212_v31, %v1210_v56  ;;  %v1217_v63 = vmul.u32 %v1213_v10, %v1211_v36 }
 0x25a   :  { %v1239_v16 = vmul.u32 %v1235_v44, %v1211_v36  ;;  %v1240_v23 = vshll.u32 %v1237_v39, 16  ;;  %v1242_v42 = vshll.u32 %v1238_v61, 16  ;;  %v1341_v11 = vor.u32 %v1340_v34, %v1339_v30 }
 0x25b   :  { %v1218_v37 = vshll.u32 %v1215_v26, 16  ;;  %v1219_v49 = vshrl.u32 %v1215_v26, 16  ;;  %v1220_v50 = vshll.u32 %v1216_v17, 16  ;;  %v1221_v9 = vshrl.u32 %v1216_v17, 16 }
 0x25c   :  { %vm1244_vm10 = vc.u32 %v1236_v15, %v1240_v23  ;;  %v1246_v24 = vadd.s32 %v1240_v23, %v1236_v15  ;;  %v1343_v45 = vshrl.u32 %v3178_v60, %v2932_v0  ;;  %v1342_v36 = vshll.u32 %v3177_v8, %v2914_v59 }
 0x25d   :  { %vm1222_vm9 = vc.u32 %v1214_v53, %v1218_v37  ;;  %v1224_v25 = vadd.s32 %v1218_v37, %v1214_v53  ;;  %v1245_v56 = vsel %vm1244_vm10, 1, %v2028_v62  ;;  %v1345_v6 = vshll.u32 %v3178_v60, %v2914_v59 }
 0x25e   :  { %v1223_v46 = vsel %vm1222_vm9, 1, %v2028_v62  ;;  %v1247_v54 = vadd.s32 %v1245_v56, %v1239_v16  ;;  %vm1248_vm4 = vc.u32 %v1246_v24, %v1242_v42  ;;  %v1344_v40 = vor.u32 %v1343_v45, %v1342_v36 }
 0x25f   :  { %v1225_v57 = vadd.s32 %v1223_v46, %v1217_v63  ;;  %vm1226_vm11 = vc.u32 %v1224_v25, %v1220_v50  ;;  %v1249_v32 = vsel %vm1248_vm4, 1, %v2028_v62  ;;  %v1346_v38 = vshrl.u32 %v3179_v4, %v2932_v0 }
 0x260   :  { %v1227_v12 = vsel %vm1226_vm11, 1, %v2028_v62  ;;  %v1241_v55 = vshrl.u32 %v1237_v39, 16  ;;  %v1243_v41 = vshrl.u32 %v1238_v61, 16  ;;  %v2985_v5 = vadd.s32 %v1246_v24, %v1242_v42 }
 0x261   :  { %v1229_v20 = vadd.s32 %v1227_v12, %v1225_v57  ;;  %v1251_v27 = vadd.s32 %v1249_v32, %v1247_v54  ;;  %v1347_v21 = vor.u32 %v1346_v38, %v1345_v6  ;;  %vm1348_vm5 = vcmp.lt.s32.totalorder %v2963_v47, 1 }
 0x262   :  { %vm1351_vm8 = vcmp.lt.s32.totalorder %v2963_v47, 4  ;;  %vm1350_vm12 = vcmp.lt.s32.totalorder %v2963_v47, 3  ;;  %v1356_v59 = vsel %vm1348_vm5, %v2965_v35, %v2967_v22  ;;  %vm1349_vm13 = vcmp.lt.s32.totalorder %v2963_v47, 2 }
 0x263   :  { %v1230_v8 = vadd.s32 %v1229_v20, %v1219_v49  ;;  %v1252_v48 = vadd.s32 %v1251_v27, %v1241_v55  ;;  %v1357_v60 = vsel %vm1351_vm8, %v1344_v40, 920167782  ;;  %v1360_v13 = vsel %vm1348_vm5, %v2967_v22, %v1341_v11 }
 0x264   :  { %v1358_v52 = vsel %vm1350_vm12, %v1341_v11, %v1357_v60  ;;  %v1200_v2 = vsel %vm1194_vm2, %v1197_v58, %v1199_v33  ;;  %v1361_v10 = vsel %vm1351_vm8, %v1347_v21, 1326507024  ;;  %v1365_v44 = vand.u32 65535, %v2916_v28 }
 0x265   :  { %v2996_v4 = vadd.s32 %v1230_v8, %v1221_v9  ;;  %v1253_v1 = vadd.s32 %v1252_v48, %v1243_v41  ;;  %v1359_v31 = vsel %vm1349_vm13, %v1356_v59, %v1358_v52  ;;  %v1362_v29 = vsel %vm1350_vm12, %v1344_v40, %v1361_v10 }
 0x266   :  { %v1389_v26 = vand.u32 65535, %v1359_v31  ;;  %v1363_v51 = vsel %vm1349_vm13, %v1360_v13, %v1362_v29  ;;  %v1366_v58 = vshrl.u32 %v2916_v28, 16  ;;  %v1390_v33 = vshrl.u32 %v1359_v31, 16 }
 0x267   :  { %vm1256_vm14 = vc.u32 %v2996_v4, %v2985_v5  ;;  %v1257_v17 = vadd.s32 1, %v1253_v1  ;;  %v1254_v34 = vmul.u32 %v2911_v14, %v1200_v2  ;;  %v1367_v53 = vand.u32 65535, %v1363_v51 }
 0x268   :  { %v1368_v39 = vshrl.u32 %v1363_v51, 16  ;;  %v1392_v30 = vmul.u32 %v1390_v33, %v1365_v44  ;;  %v1393_v63 = vmul.u32 %v1389_v26, %v1366_v58  ;;  %v1332_v15 = vshrl.u32 %v2027_v18, %v2932_v0 }
 0x269   :  { %v1258_v61 = vsel %vm1256_vm14, %v1257_v17, %v1253_v1  ;;  %v1371_v49 = vmul.u32 %v1367_v53, %v1366_v58  ;;  %v1353_v50 = vsel %vm1351_vm8, %v1341_v11, 2102212464  ;;  %v1391_v9 = vmul.u32 %v1389_v26, %v1365_v44 }
 0x26a   :  { %v1259_v37 = vadd.s32 %v1258_v61, %v1254_v34  ;;  %v1370_v16 = vmul.u32 %v1368_v39, %v1365_v44  ;;  %v1394_v23 = vmul.u32 %v1390_v33, %v1366_v58  ;;  %v1395_v25 = vshll.u32 %v1392_v30, 16 }
 0x26b   :  { %v1369_v46 = vmul.u32 %v1367_v53, %v1365_v44  ;;  %v1372_v14 = vmul.u32 %v1368_v39, %v1366_v58  ;;  %v1375_v45 = vshll.u32 %v1371_v49, 16  ;;  %v1397_v57 = vshll.u32 %v1393_v63, 16 }
 0x26c   :  { %v1260_v42 = vadd.s32 536870912, %v1259_v37  ;;  %v1373_v24 = vshll.u32 %v1370_v16, 16  ;;  %vm1399_vm15 = vc.u32 %v1391_v9, %v1395_v25  ;;  %v1401_v56 = vadd.s32 %v1395_v25, %v1391_v9 }
 0x26d   :  { %v1400_v0 = vsel %vm1399_vm15, 1, %v2028_v62  ;;  %v1352_v6 = vsel %vm1348_vm5, %v1332_v15, %v2965_v35  ;;  %v1354_v32 = vsel %vm1350_vm12, %v2967_v22, %v1353_v50  ;;  %v1396_v38 = vshrl.u32 %v1392_v30, 16  ;;  %v1986_v50 = vld [vmem:[%s3140_s6 + $0x70] sm:$0xff] }
 0x26e   :  { %v3023_v36 = vshrl.u32 %v1260_v42, 30  ;;  %vm1377_vm7 = vc.u32 %v1369_v46, %v1373_v24  ;;  %v1379_v18 = vadd.s32 %v1373_v24, %v1369_v46  ;;  %v1402_v11 = vadd.s32 %v1400_v0, %v1394_v23  ;;  %v1985_v24 = vld [vmem:[%s3140_s6 + $0x68] sm:$0xff] }
 0x26f   :  { %v1378_v12 = vsel %vm1377_vm7, 1, %v2028_v62  ;;  %vm1403_vm1 = vc.u32 %v1401_v56, %v1397_v57  ;;  %v1374_v27 = vshrl.u32 %v1370_v16, 16  ;;  %v1376_v48 = vshrl.u32 %v1371_v49, 16  ;;  %v1978_v49 = vld [vmem:[%s3140_s6 + $0x30] sm:$0xff] }
 0x270   :  { %v1262_v54 = vshll.u32 %v3023_v36, 30  ;;  %v1380_v20 = vadd.s32 %v1378_v12, %v1372_v14  ;;  %vm1381_vm2 = vc.u32 %v1379_v18, %v1375_v45  ;;  %v1404_v55 = vsel %vm1403_vm1, 1, %v2028_v62  ;;  %v1977_v14 = vld [vmem:[%s3140_s6 + $0x28] sm:$0xff]  ;;  %v1976_v12 = vld [vmem:[%s3140_s6 + $0x20] sm:$0xff] }
 0x271   :  { %v1382_v40 = vsel %vm1381_vm2, 1, %v2028_v62  ;;  %v1406_v21 = vadd.s32 %v1404_v55, %v1402_v11  ;;  %v1398_v59 = vshrl.u32 %v1393_v63, 16  ;;  %v1355_v13 = vsel %vm1349_vm13, %v1352_v6, %v1354_v32  ;;  %v1979_v63 = vld [vmem:[%s3140_s6 + $0x38] sm:$0xff]  ;;  %v1984_v11 = vld [vmem:[%s3140_s6 + $0x60] sm:$0xff] }
 0x272   :  { %v1263_v41 = vsub.s32 %v1259_v37, %v1262_v54  ;;  %v1384_v8 = vadd.s32 %v1382_v40, %v1380_v20  ;;  %v1405_v1 = vadd.s32 %v1401_v56, %v1397_v57  ;;  %v1409_v44 = vmul.u32 %v2916_v28, %v1355_v13  ;;  %v1987_v28 = vld [vmem:[%s3140_s6 + $0x78] sm:$0xff]  ;;  %1601 = vmatpush.bf16.msra.mxu2 %v1979_v63  ;;  %v1982_v13 = vld [vmem:[%s3140_s6 + $0x50] sm:$0xff]  ;;  %v1980_v63 = vld [vmem:[%s3140_s6 + $0x40] sm:$0xff] }
 0x273   :  { %v1407_v52 = vadd.s32 %v1406_v21, %v1396_v38  ;;  %v1255_v58 = vadd.s32 %v2985_v5, %v2996_v4  ;;  %1614 = vmatpush.bf16.msra.mxu3 %v1987_v28  ;;  %vm1163_vm11 = vcmp.lt.s32.totalorder %v2899_v3, 0  ;;  %vm3065_vm4 = vcmp.le.f32.partialorder %v1161_v7, 0.7853982  ;;  %v1975_v32 = vld [vmem:[%s3140_s6 + $0x18] sm:$0xff] }
 0x274   :  { %vm1264_vm3 = vcmp.lt.s32.totalorder %v1263_v41, 0  ;;  %v1265_v60 = vsub.s32 0, %v1263_v41  ;;  %v1385_v35 = vadd.s32 %v1384_v8, %v1374_v27  ;;  %v1285_v54 = vsub.s32 4, %v3023_v36  ;;  %v1983_v40 = vld [vmem:[%s3140_s6 + $0x58] sm:$0xff] }
 0x275   :  { %v1408_v31 = vadd.s32 %v1407_v52, %v1398_v59  ;;  %v1974_v52 = vld [vmem:[%s3140_s6 + $0x10] sm:$0xff]  ;;  %vm1318_vm8 = vcmp.lt.s32.totalorder %v2901_v43, 0  ;;  %vm3113_vm12 = vcmp.le.f32.partialorder %v1316_v19, 0.7853982  ;;  %vm1304_vm7 = vweird.f32 %v2899_v3 }
 0x276   :  { %v1266_v2 = vsel %vm1264_vm3, %v1265_v60, %v1263_v41  ;;  %v1386_v22 = vadd.s32 %v1385_v35, %v1376_v48  ;;  %1602 = vmatpush.bf16.msra.mxu2 %v1978_v49  ;;  %v1286_v21 = vsel %vm1163_vm11, %v1285_v54, %v3023_v36 }
 0x277   :  { %v1267_v10 = vclz %v1266_v2  ;;  %v1412_v62 = vadd.s32 1, %v1408_v31  ;;  %1615 = vmatpush.bf16.msra.mxu3 %v1986_v50  ;;  %v1288_v36 = vsel %vm3065_vm4, 0, %v1286_v21 }
 0x278   :  { %vm1411_vm6 = vc.u32 %v1386_v22, %v1405_v1  ;;  %v1410_v38 = vadd.s32 %v1405_v1, %v1386_v22 }
 0x279   :  { %v1855_v29 = vadd.s32 4294967294, %v1267_v10  ;;  %v1413_v26 = vsel %vm1411_vm6, %v1412_v62, %v1408_v31  ;;  %vm1459_vm6 = vweird.f32 %v2901_v43 }
 0x27a   :  { %v1414_v17 = vadd.s32 %v1413_v26, %v1409_v44  ;;  %1603 = vmatpush.bf16.msra.mxu2 %v1977_v14  ;;  %v1973_v44 = vld [vmem:[%s3140_s6 + $0x8] sm:$0xff] }
 0x27b   :  { %vm1856_vm9 = vcmp.lt.s32.totalorder %v1855_v29, 0  ;;  %1616 = vmatpush.bf16.msra.mxu3 %v1985_v24  ;;  %v1981_v26 = vld [vmem:[%s3140_s6 + $0x48] sm:$0xff] }
 0x27c   :  { %v1270_v51 = vsel %vm1856_vm9, 0, %v1855_v29  ;;  %v1415_v34 = vadd.s32 536870912, %v1414_v17 }
 0x27d   :  { %v1271_v33 = vsub.s32 32, %v1270_v51  ;;  %v1275_v47 = vsub.s32 4294967266, %v1270_v51  ;;  %v1272_v53 = vshll.u32 %v1263_v41, %v1270_v51 }
 0x27e   :  { %v3041_v30 = vshrl.u32 %v1415_v34, 30  ;;  %1604 = vmatpush.bf16.msra.mxu2 %v1976_v12 }
 0x27f   :  { %v1273_v39 = vshrl.u32 %v1255_v58, %v1271_v33  ;;  %v1276_v61 = vadd.s32 127, %v1275_v47  ;;  %1617 = vmatpush.bf16.msra.mxu3 %v1984_v11  ;;  %v1305_v33 = vadd.s32 3, %v1288_v36 }
 0x280   :  { %v1417_v5 = vshll.u32 %v3041_v30, 30  ;;  %v1440_v50 = vsub.s32 4, %v3041_v30 }
 0x281   :  { %v1274_v37 = vor.u32 %v1273_v39, %v1272_v53  ;;  %v1277_v15 = vshll.u32 %v1276_v61, 23  ;;  %v1972_v61 = vld [vmem:[%s3140_s6] sm:$0xff]  ;;  %s2029_s6 = smov [#allocation2]  }
 0x282   :  { %v1418_v16 = vsub.s32 %v1414_v17, %v1417_v5  ;;  %1605 = vmatpush.bf16.msra.mxu2 %v1975_v32  ;;  %s1633_s30 = sshll.u32 %s2029_s6, 4  ;;  %s1634_s30 = int_to_ptr.vmem [resolvable:$true] %s1633_s30 }
 0x283   :  { %v1278_v4 = vor.u32 4788187, %v1277_v15  ;;  %v1281_v23 = vcvt.s32.f32 %v1274_v37  ;;  %1618 = vmatpush.bf16.msra.mxu3 %v1983_v40  ;;  %v1306_v15 = vand.u32 3, %v1305_v33 }
 0x284   :  { %vm1419_vm10 = vcmp.lt.s32.totalorder %v1418_v16, 0  ;;  %v1420_v25 = vsub.s32 0, %v1418_v16 }
 0x285   :  { %v1279_v9 = vand.u32 2147483647, %v1278_v4  ;;  %vm1308_vm13 = vcmp.eq.s32.totalorder %v1306_v15, 0  ;;  %vm1311_vm14 = vcmp.eq.s32.totalorder %v1306_v15, 2  ;;  %vm1307_vm15 = vcmp.lt.s32.totalorder %v1306_v15, 2 }
 0x286   :  { %v1421_v46 = vsel %vm1419_vm10, %v1420_v25, %v1418_v16  ;;  %1606 = vmatpush.bf16.msra.mxu2 %v1974_v52 }
 0x287   :  { %v1282_v42 = vmul.f32 %v1281_v23, %v1279_v9  ;;  %v1422_v45 = vclz %v1421_v46  ;;  %1619 = vmatpush.bf16.msra.mxu3 %v1982_v13 }
 0x289   :  { %v1283_v57 = vxor.u32 2147483648, %v1282_v42  ;;  %v1858_v56 = vadd.s32 4294967294, %v1422_v45  ;;  %v1441_v45 = vsel %vm1318_vm8, %v1440_v50, %v3041_v30 }
 0x28a   :  { %1607 = vmatpush.bf16.msra.mxu2 %v1973_v44  ;;  %v1443_v12 = vsel %vm3113_vm12, 0, %v1441_v45 }
 0x28b   :  { %v1284_v0 = vsel %vm1163_vm11, %v1283_v57, %v1282_v42  ;;  %vm1859_vm5 = vcmp.lt.s32.totalorder %v1858_v56, 0  ;;  %1620 = vmatpush.bf16.msra.mxu3 %v1981_v26 }
 0x28c   :  { %v1287_v7 = vsel %vm3065_vm4, %v2899_v3, %v1284_v0  ;;  %v1425_v20 = vsel %vm1859_vm5, 0, %v1858_v56 }
 0x28d   :  { %v1289_v6 = vmul.f32 %v1287_v7, %v1287_v7  ;;  %v1426_v55 = vsub.s32 32, %v1425_v20  ;;  %v1430_v41 = vsub.s32 4294967266, %v1425_v20  ;;  %v1427_v48 = vshll.u32 %v1418_v16, %v1425_v20 }
 0x28e   :  { %1608 = vmatpush.bf16.msra.mxu2 %v1972_v61  ;;  %v1460_v20 = vadd.s32 3, %v1443_v12 }
 0x28f   :  { %v1297_v27 = vmul.f32 -0.00019511016, %v1289_v6  ;;  %v1290_v8 = vmul.f32 -0.001358992, %v1289_v6  ;;  %v1428_v59 = vshrl.u32 %v1410_v38, %v1426_v55  ;;  %v1431_v60 = vadd.s32 127, %v1430_v41  ;;  %1621 = vmatpush.bf16.msra.mxu3 %v1980_v63 }
 0x290   :  { %v1461_v55 = vand.u32 3, %v1460_v20 }
 0x291   :  { %v1298_v35 = vadd.f32 0.008332121, %v1297_v27  ;;  %v1291_v2 = vadd.f32 0.041655596, %v1290_v8  ;;  %v1429_v22 = vor.u32 %v1428_v59, %v1427_v48  ;;  %v1432_v1 = vshll.u32 %v1431_v60, 23 }
 0x292   :  { %vm1463_vm1 = vcmp.eq.s32.totalorder %v1461_v55, 0  ;;  %vm1466_vm2 = vcmp.eq.s32.totalorder %v1461_v55, 2  ;;  %vm1462_vm3 = vcmp.lt.s32.totalorder %v1461_v55, 2 }
 0x293   :  { %v1299_v31 = vmul.f32 %v1298_v35, %v1289_v6  ;;  %v1292_v10 = vmul.f32 %v1291_v2, %v1289_v6  ;;  %v1433_v62 = vor.u32 4788187, %v1432_v1  ;;  %v1436_v58 = vcvt.s32.f32 %v1429_v22 }
 0x295   :  { %v1300_v29 = vadd.f32 -0.16666654, %v1299_v31  ;;  %v1293_v17 = vadd.f32 -0.4999988, %v1292_v10  ;;  %v1434_v51 = vand.u32 2147483647, %v1433_v62 }
 0x297   :  { %v1301_v47 = vmul.f32 %v1300_v29, %v1289_v6  ;;  %v1294_v34 = vmul.f32 %v1293_v17, %v1289_v6  ;;  %v1437_v53 = vmul.f32 %v1436_v58, %v1434_v51 }
 0x299   :  { %v1302_v39 = vadd.f32 1.0, %v1301_v47  ;;  %v1295_v28 = vadd.f32 1.0, %v1294_v34  ;;  %v1438_v37 = vxor.u32 2147483648, %v1437_v53 }
 0x29b   :  { %v1303_v5 = vmul.f32 %v1302_v39, %v1287_v7  ;;  %v1312_v4 = vxor.u32 2147483648, %v1295_v28  ;;  %v1439_v49 = vsel %vm1318_vm8, %v1438_v37, %v1437_v53 }
 0x29c   :  { %v1442_v9 = vsel %vm3113_vm12, %v2901_v43, %v1439_v49 }
 0x29d   :  { %v1309_v23 = vxor.u32 2147483648, %v1303_v5  ;;  %v1444_v25 = vmul.f32 %v1442_v9, %v1442_v9  ;;  %v1313_v42 = vsel %vm1311_vm14, %v1312_v4, %v1303_v5 }
 0x29f   :  { %v1310_v19 = vsel %vm1308_vm13, %v1295_v28, %v1309_v23  ;;  %v1452_v46 = vmul.f32 -0.00019511016, %v1444_v25  ;;  %v1445_v24 = vmul.f32 -0.001358992, %v1444_v25 }
 0x2a0   :  { %v1314_v14 = vsel %vm1307_vm15, %v1310_v19, %v1313_v42 }
 0x2a1   :  { %v1315_v57 = vsel %vm1304_vm7, nan, %v1314_v14  ;;  %v1453_v56 = vadd.f32 0.008332121, %v1452_v46  ;;  %v1446_v0 = vadd.f32 0.041655596, %v1445_v24 }
 0x2a2   :  { %v1471_v18 = vpack.c.bf16 %v1315_v57, %v1315_v57 }
 0x2a3   :  { %v1454_v11 = vmul.f32 %v1453_v56, %v1444_v25  ;;  %v1447_v54 = vmul.f32 %v1446_v0, %v1444_v25 }
 0x2a4   :  { %1609 = vmatmul.bf16.vlgmr.msra.gmra.mxu2 %v1471_v18 }
 0x2a5   :  { %v1455_v7 = vadd.f32 -0.16666654, %v1454_v11  ;;  %v1448_v6 = vadd.f32 -0.4999988, %v1447_v54 }
 0x2a7   :  { %v1456_v3 = vmul.f32 %v1455_v7, %v1444_v25  ;;  %v1449_v32 = vmul.f32 %v1448_v6, %v1444_v25 }
 0x2a9   :  { %v1457_v40 = vadd.f32 1.0, %v1456_v3  ;;  %v1450_v38 = vadd.f32 1.0, %v1449_v32 }
 0x2ab   :  { %v1458_v41 = vmul.f32 %v1457_v40, %v1442_v9  ;;  %v1467_v30 = vxor.u32 2147483648, %v1450_v38 }
 0x2ad   :  { %v1464_v27 = vxor.u32 2147483648, %v1458_v41  ;;  %v1468_v21 = vsel %vm1466_vm2, %v1467_v30, %v1458_v41 }
 0x2af   :  { %v1465_v8 = vsel %vm1463_vm1, %v1450_v38, %v1464_v27 }
 0x2b0   :  { %v1469_v48 = vsel %vm1462_vm3, %v1465_v8, %v1468_v21 }
 0x2b1   :  { %v1470_v59 = vsel %vm1459_vm6, nan, %v1469_v48 }
 0x2b2   :  { %v1472_v60 = vpack.c.bf16 %v1470_v59, %v1470_v59 }
 0x2b4   :  { %1622 = vmatmul.bf16.vlgmr.msra.gmra.mxu3 %v1472_v60 }
 0x327   :  { %v1610_v35 = vpop.f32.mrf.mxu2 }
 0x32f   :  { %v1612_v52 = vpop.f32.mrf.mxu2 }
 0x337   :  { %v1623_v13 = vpop.f32.mrf.mxu3 }
 0x338   :  { %v1624_v2 = vadd.f32 %v1623_v13, %v1610_v35 }
 0x33a   :  { %1627 = vst.msk [vmem:[#allocation2] sm:$0xff] %vm88_vm0, %v1624_v2 }
 0x33b   :  { %1638 = dma.vmem_to_hbm [thread:$0]  %s1634_s30, 128, %s1636_s10, [#allocation3]  }
 0x33f   :  { %v1625_v43 = vpop.f32.mrf.mxu3 }
 0x340   :  { %2020 = dma.done.wait [#allocation3], 128  }
 0x341   :  { %2021 = vsyncadd [#allocation3], 4294967168 }
 0x342   :  { %1643 = vsyncpa [#allocation3], 1 }

</bundles_post_ra>
